<compile_context>
chip_gen: v6e
topology: v6e:2x2x1
jax: 0.10.0
libtpu: 0.0.40
codegen_flags: <defaults>
</compile_context>

<pallas_src>
import functools

import jax
import jax.numpy as jnp
from jax.experimental import pallas as pl
from jax.experimental.pallas import tpu as pltpu


def lstm_bidir_fused_kernel(x_ref, lens_ref, wih_f_ref, wih_b_ref, b_ref, whh_ref,
                            out_ref, hn_ref, cn_ref, *, T, B, H):
    """Fused bidirectional LSTM; whole (small) problem resident in VMEM.

    Gate lane layout (G = 8H lanes): [ i_f | i_b | f_f | f_b | o_f | o_b | g_f | g_b ]

    x_ref:    (T*B, I)   time-major flattened inputs (row index = t*B + b)
    lens_ref: (B, 1)     int32 valid lengths (padded batch rows have length 0)
    wih_f/b:  (I, 8H)    input->gate weights; zeros in the other direction's lanes
    b_ref:    (1, 8H)    bias_ih + bias_hh for both directions (fused layout)
    whh_ref:  (2H, 8H)   block-diagonal recurrent weights
    out_ref:  (B, T*2H)  hidden outputs, row-major over (t, [fwd | bwd])
    hn_ref:   (B, 2H)    final hidden state [fwd | bwd]
    cn_ref:   (B, 2H)    final cell state   [fwd | bwd]
    """
    H2 = 2 * H
    lens = lens_ref[...]                                   # (B, 1) int32

    # Hoisted input projection for both directions (two small MXU calls),
    # bias folded once.  Only h @ W_hh remains inside the serial recurrence.
    x = x_ref[...]                                         # (T*B, I)
    gf = jnp.dot(x, wih_f_ref[...], preferred_element_type=jnp.float32)   # (T*B, 8H)
    gb = jnp.dot(x, wih_b_ref[...], preferred_element_type=jnp.float32)   # (T*B, 8H)
    bias = b_ref[...]

    # Fused step s pairs forward time s with backward time T-1-s.
    # Static slices, combined once up front (off the recurrent critical path).
    gx = [gf[s * B:(s + 1) * B, :] + gb[(T - 1 - s) * B:(T - s) * B, :] + bias
          for s in range(T)]

    whh = whh_ref[...]                                     # (2H, 8H)

    h_all = jnp.zeros((B, H2), jnp.float32)                # [h_fwd | h_bwd]
    c_all = jnp.zeros((B, H2), jnp.float32)

    fwd_h = []
    bwd_h = []
    for s in range(T):                                     # fully unrolled recurrence
        t_b = T - 1 - s
        gates = gx[s] + jnp.dot(h_all, whh, preferred_element_type=jnp.float32)
        sig = jax.nn.sigmoid(gates[:, :3 * H2])            # i|f|o : one 6H slice
        g_all = jnp.tanh(gates[:, 3 * H2:])                # g     : one 2H slice
        i_all = sig[:, 0:H2]
        f_all = sig[:, H2:2 * H2]
        o_all = sig[:, 2 * H2:3 * H2]
        c_new = f_all * c_all + i_all * g_all
        h_new = o_all * jnp.tanh(c_new)

        # Packed-sequence masking.  step_t is a compile-time constant row:
        # first H lanes compare against forward time s, last H against T-1-s.
        step_t = jnp.concatenate(
            [jnp.full((1, H), s, jnp.int32), jnp.full((1, H), t_b, jnp.int32)],
            axis=-1)                                       # (1, 2H)
        upd = step_t < lens                                # (B, 2H) bool
        h_all = jnp.where(upd, h_new, h_all)
        c_all = jnp.where(upd, c_new, c_all)

        m_f = s < lens                                     # (B, 1)
        m_b = t_b < lens
        fwd_h.append(jnp.where(m_f, h_new[:, :H], 0.0))    # zero padding like
        bwd_h.append(jnp.where(m_b, h_new[:, H:], 0.0))    # pad_packed_sequence

    # Single lane-dense store: row-major (t, [fwd@t | bwd@t]) -> (B, T*2H).
    rows = [jnp.concatenate([fwd_h[t], bwd_h[T - 1 - t]], axis=-1) for t in range(T)]
    out_ref[...] = jnp.concatenate(rows, axis=-1)

    hn_ref[...] = h_all
    cn_ref[...] = c_all


@jax.jit
def rnn_layer_forward(emb_inputs, input_lengths,
                      wih_f, whh_f, b_f, wih_b, whh_b, b_b):
    """Equivalent of RNN_layer.forward -> (rnn_out, (h_n, c_n))."""
    B, T, I = emb_inputs.shape
    H = whh_f.shape[0]
    Bp = ((B + 7) // 8) * 8                      # pad batch to f32 sublane multiple

    x = emb_inputs.astype(jnp.float32)
    x = jnp.pad(x, ((0, Bp - B), (0, 0), (0, 0)))
    x_flat = jnp.transpose(x, (1, 0, 2)).reshape(T * Bp, I)      # row = t*Bp + b
    lens = jnp.pad(input_lengths.astype(jnp.int32), (0, Bp - B)).reshape(Bp, 1)

    def gate_blocks(w):   # PyTorch LSTM gate order along last axis: i, f, g, o
        return w[..., 0:H], w[..., H:2 * H], w[..., 2 * H:3 * H], w[..., 3 * H:4 * H]

    # Fused lane layout: [i_f i_b | f_f f_b | o_f o_b | g_f g_b].  Each
    # direction's input matrix carries zeros in the other direction's lanes so
    # the matmul itself places results in the right lanes (no in-kernel lane
    # shuffling).
    i_f, f_f, g_f, o_f = gate_blocks(wih_f)
    i_b, f_b, g_b, o_b = gate_blocks(wih_b)
    zi = jnp.zeros((I, H), jnp.float32)
    wih_fc = jnp.concatenate([i_f, zi, f_f, zi, o_f, zi, g_f, zi], axis=-1)   # (I, 8H)
    wih_bc = jnp.concatenate([zi, i_b, zi, f_b, zi, o_b, zi, g_b], axis=-1)   # (I, 8H)

    hi_f, hf_f, hg_f, ho_f = gate_blocks(whh_f)
    hi_b, hf_b, hg_b, ho_b = gate_blocks(whh_b)
    zh = jnp.zeros((H, H), jnp.float32)
    whh_all = jnp.concatenate([
        jnp.concatenate([hi_f, zh, hf_f, zh, ho_f, zh, hg_f, zh], axis=-1),
        jnp.concatenate([zh, hi_b, zh, hf_b, zh, ho_b, zh, hg_b], axis=-1)],
        axis=0)                                                              # (2H, 8H)

    bi_f, bf_f, bg_f, bo_f = gate_blocks(b_f)
    bi_b, bf_b, bg_b, bo_b = gate_blocks(b_b)
    b_all = jnp.concatenate(
        [bi_f, bi_b, bf_f, bf_b, bo_f, bo_b, bg_f, bg_b], axis=-1)           # (1, 8H)

    vmem = pl.BlockSpec(memory_space=pltpu.MemorySpace.VMEM)
    kernel = functools.partial(lstm_bidir_fused_kernel, T=T, B=Bp, H=H)
    out_flat, hn_all, cn_all = pl.pallas_call(
        kernel,
        out_shape=(
            jax.ShapeDtypeStruct((Bp, T * 2 * H), jnp.float32),
            jax.ShapeDtypeStruct((Bp, 2 * H), jnp.float32),
            jax.ShapeDtypeStruct((Bp, 2 * H), jnp.float32),
        ),
        in_specs=[vmem] * 6,
        out_specs=(vmem, vmem, vmem),
    )(x_flat, lens, wih_fc, wih_bc, b_all, whh_all)

    rnn_out = out_flat[:B].reshape(B, T, 2 * H)   # batch_first bidirectional output
    h_n = jnp.stack([hn_all[:B, :H], hn_all[:B, H:]], axis=0)   # (2, B, H)
    c_n = jnp.stack([cn_all[:B, :H], cn_all[:B, H:]], axis=0)   # (2, B, H)
    return rnn_out, (h_n, c_n)


# ----------------------------------------------------------------------------
# Pure-JAX reference (mirrors PyTorch packed-sequence LSTM semantics) used to
# validate the Pallas kernel before printing KERNEL_OK.
# ----------------------------------------------------------------------------
def _lstm_dir_ref(x, lengths, wih, whh, b, reverse):
    B, T, I = x.shape
    H = whh.shape[0]
    h = jnp.zeros((B, H), jnp.float32)
    c = jnp.zeros((B, H), jnp.float32)
    out = jnp.zeros((B, T, H), jnp.float32)
    ts = range(T - 1, -1, -1) if reverse else range(T)
    for t in ts:
        gates = x[:, t, :] @ wih + h @ whh + b
        i_g = jax.nn.sigmoid(gates[:, 0 * H:1 * H])
        f_g = jax.nn.sigmoid(gates[:, 1 * H:2 * H])
        g_g = jnp.tanh(gates[:, 2 * H:3 * H])
        o_g = jax.nn.sigmoid(gates[:, 3 * H:4 * H])
        c_new = f_g * c + i_g * g_g
        h_new = o_g * jnp.tanh(c_new)
        mask = (t < lengths).reshape(B, 1)
        h = jnp.where(mask, h_new, h)
        c = jnp.where(mask, c_new, c)
        out = out.at[:, t, :].set(jnp.where(mask, h_new, 0.0))
    return out, h, c


def rnn_layer_reference(emb_inputs, input_lengths,
                        wih_f, whh_f, b_f, wih_b, whh_b, b_b):
    of, hf, cf = _lstm_dir_ref(emb_inputs, input_lengths, wih_f, whh_f, b_f, False)
    ob, hb, cb = _lstm_dir_ref(emb_inputs, input_lengths, wih_b, whh_b, b_b, True)
    rnn_out = jnp.concatenate([of, ob], axis=-1)
    h_n = jnp.stack([hf, hb], axis=0)
    c_n = jnp.stack([cf, cb], axis=0)
    return rnn_out, (h_n, c_n)


if __name__ == "__main__":
    # Small shapes consistent with the module: batch=2, seq=8, inp_dim=16,
    # out_dim=32 (bidirectional -> 16 per direction).
    B, T, I, OUT = 2, 8, 16, 32
    H = OUT // 2

    key = jax.random.PRNGKey(0)
    k = 1.0 / jnp.sqrt(H)  # PyTorch LSTM default init: U(-1/sqrt(H), 1/sqrt(H))
    keys = jax.random.split(key, 10)

    # Weights stored pre-transposed: W_ih^T (I,4H), W_hh^T (H,4H); bias = b_ih+b_hh.
    wih_f = jax.random.uniform(keys[0], (I, 4 * H), jnp.float32, -k, k)
    whh_f = jax.random.uniform(keys[1], (H, 4 * H), jnp.float32, -k, k)
    b_f = (jax.random.uniform(keys[2], (1, 4 * H), jnp.float32, -k, k)
           + jax.random.uniform(keys[3], (1, 4 * H), jnp.float32, -k, k))
    wih_b = jax.random.uniform(keys[4], (I, 4 * H), jnp.float32, -k, k)
    whh_b = jax.random.uniform(keys[5], (H, 4 * H), jnp.float32, -k, k)
    b_b = (jax.random.uniform(keys[6], (1, 4 * H), jnp.float32, -k, k)
           + jax.random.uniform(keys[7], (1, 4 * H), jnp.float32, -k, k))

    emb_inputs = jax.random.normal(keys[8], (B, T, I), jnp.float32)
    # pack_padded_sequence(enforce_sorted=True) expects descending lengths.
    input_lengths = jnp.array([T, 5], dtype=jnp.int32)

    rnn_out, (h_n, c_n) = rnn_layer_forward(
        emb_inputs, input_lengths, wih_f, whh_f, b_f, wih_b, whh_b, b_b)
    jax.block_until_ready((rnn_out, h_n, c_n))

    ref_out, (ref_hn, ref_cn) = rnn_layer_reference(
        emb_inputs, input_lengths, wih_f, whh_f, b_f, wih_b, whh_b, b_b)

    assert rnn_out.shape == (B, T, OUT)
    assert h_n.shape == (2, B, H) and c_n.shape == (2, B, H)
    assert jnp.allclose(rnn_out, ref_out, rtol=1e-4, atol=1e-4)
    assert jnp.allclose(h_n, ref_hn, rtol=1e-4, atol=1e-4)
    assert jnp.allclose(c_n, ref_cn, rtol=1e-4, atol=1e-4)

    print("KERNEL_OK")
</pallas_src>

<mosaic_0001>
module attributes {stable_mosaic.version = 11 : i64} {
  func.func @lstm_bidir_fused_kernel(%arg0: memref<64x16xf32, #tpu.memory_space<vmem>>, %arg1: memref<8x1xi32, #tpu.memory_space<vmem>>, %arg2: memref<16x128xf32, #tpu.memory_space<vmem>>, %arg3: memref<16x128xf32, #tpu.memory_space<vmem>>, %arg4: memref<1x128xf32, #tpu.memory_space<vmem>>, %arg5: memref<32x128xf32, #tpu.memory_space<vmem>>, %arg6: memref<8x256xf32, #tpu.memory_space<vmem>>, %arg7: memref<8x32xf32, #tpu.memory_space<vmem>>, %arg8: memref<8x32xf32, #tpu.memory_space<vmem>>) attributes {dimension_semantics = [], scalar_prefetch = 0 : i64, scratch_operands = 0 : i64, tpu.core_type = #tpu.core_type<tc>} {
    %c0 = arith.constant 0 : index
    %c0_0 = arith.constant 0 : index
    %0 = vector.load %arg1[%c0, %c0_0] : memref<8x1xi32, #tpu.memory_space<vmem>>, vector<8x1xi32>
    %c0_1 = arith.constant 0 : index
    %c0_2 = arith.constant 0 : index
    %1 = vector.load %arg0[%c0_1, %c0_2] : memref<64x16xf32, #tpu.memory_space<vmem>>, vector<64x16xf32>
    %c0_3 = arith.constant 0 : index
    %c0_4 = arith.constant 0 : index
    %2 = vector.load %arg2[%c0_3, %c0_4] : memref<16x128xf32, #tpu.memory_space<vmem>>, vector<16x128xf32>
    %cst = arith.constant dense<0.000000e+00> : vector<64x128xf32>
    %3 = tpu.matmul %1, %2, %cst {dimension_numbers = #tpu.dot_dimension_numbers<[1], [0], [0], [1], [0, 0, 1, 1], [], []>} : vector<64x16xf32>, vector<16x128xf32>, vector<64x128xf32> -> vector<64x128xf32>
    %c0_5 = arith.constant 0 : index
    %c0_6 = arith.constant 0 : index
    %4 = vector.load %arg3[%c0_5, %c0_6] : memref<16x128xf32, #tpu.memory_space<vmem>>, vector<16x128xf32>
    %cst_7 = arith.constant dense<0.000000e+00> : vector<64x128xf32>
    %5 = tpu.matmul %1, %4, %cst_7 {dimension_numbers = #tpu.dot_dimension_numbers<[1], [0], [0], [1], [0, 0, 1, 1], [], []>} : vector<64x16xf32>, vector<16x128xf32>, vector<64x128xf32> -> vector<64x128xf32>
    %c0_8 = arith.constant 0 : index
    %c0_9 = arith.constant 0 : index
    %6 = vector.load %arg4[%c0_8, %c0_9] : memref<1x128xf32, #tpu.memory_space<vmem>>, vector<1x128xf32>
    %7 = vector.extract_strided_slice %3 {offsets = [0, 0], sizes = [8, 128], strides = [1, 1]} : vector<64x128xf32> to vector<8x128xf32>
    %8 = vector.extract_strided_slice %5 {offsets = [56, 0], sizes = [8, 128], strides = [1, 1]} : vector<64x128xf32> to vector<8x128xf32>
    %9 = arith.addf %7, %8 : vector<8x128xf32>
    %10 = vector.broadcast %6 : vector<1x128xf32> to vector<8x128xf32>
    %11 = arith.addf %9, %10 : vector<8x128xf32>
    %12 = vector.extract_strided_slice %3 {offsets = [8, 0], sizes = [8, 128], strides = [1, 1]} : vector<64x128xf32> to vector<8x128xf32>
    %13 = vector.extract_strided_slice %5 {offsets = [48, 0], sizes = [8, 128], strides = [1, 1]} : vector<64x128xf32> to vector<8x128xf32>
    %14 = arith.addf %12, %13 : vector<8x128xf32>
    %15 = vector.broadcast %6 : vector<1x128xf32> to vector<8x128xf32>
    %16 = arith.addf %14, %15 : vector<8x128xf32>
    %17 = vector.extract_strided_slice %3 {offsets = [16, 0], sizes = [8, 128], strides = [1, 1]} : vector<64x128xf32> to vector<8x128xf32>
    %18 = vector.extract_strided_slice %5 {offsets = [40, 0], sizes = [8, 128], strides = [1, 1]} : vector<64x128xf32> to vector<8x128xf32>
    %19 = arith.addf %17, %18 : vector<8x128xf32>
    %20 = vector.broadcast %6 : vector<1x128xf32> to vector<8x128xf32>
    %21 = arith.addf %19, %20 : vector<8x128xf32>
    %22 = vector.extract_strided_slice %3 {offsets = [24, 0], sizes = [8, 128], strides = [1, 1]} : vector<64x128xf32> to vector<8x128xf32>
    %23 = vector.extract_strided_slice %5 {offsets = [32, 0], sizes = [8, 128], strides = [1, 1]} : vector<64x128xf32> to vector<8x128xf32>
    %24 = arith.addf %22, %23 : vector<8x128xf32>
    %25 = vector.broadcast %6 : vector<1x128xf32> to vector<8x128xf32>
    %26 = arith.addf %24, %25 : vector<8x128xf32>
    %27 = vector.extract_strided_slice %3 {offsets = [32, 0], sizes = [8, 128], strides = [1, 1]} : vector<64x128xf32> to vector<8x128xf32>
    %28 = vector.extract_strided_slice %5 {offsets = [24, 0], sizes = [8, 128], strides = [1, 1]} : vector<64x128xf32> to vector<8x128xf32>
    %29 = arith.addf %27, %28 : vector<8x128xf32>
    %30 = vector.broadcast %6 : vector<1x128xf32> to vector<8x128xf32>
    %31 = arith.addf %29, %30 : vector<8x128xf32>
    %32 = vector.extract_strided_slice %3 {offsets = [40, 0], sizes = [8, 128], strides = [1, 1]} : vector<64x128xf32> to vector<8x128xf32>
    %33 = vector.extract_strided_slice %5 {offsets = [16, 0], sizes = [8, 128], strides = [1, 1]} : vector<64x128xf32> to vector<8x128xf32>
    %34 = arith.addf %32, %33 : vector<8x128xf32>
    %35 = vector.broadcast %6 : vector<1x128xf32> to vector<8x128xf32>
    %36 = arith.addf %34, %35 : vector<8x128xf32>
    %37 = vector.extract_strided_slice %3 {offsets = [48, 0], sizes = [8, 128], strides = [1, 1]} : vector<64x128xf32> to vector<8x128xf32>
    %38 = vector.extract_strided_slice %5 {offsets = [8, 0], sizes = [8, 128], strides = [1, 1]} : vector<64x128xf32> to vector<8x128xf32>
    %39 = arith.addf %37, %38 : vector<8x128xf32>
    %40 = vector.broadcast %6 : vector<1x128xf32> to vector<8x128xf32>
    %41 = arith.addf %39, %40 : vector<8x128xf32>
    %42 = vector.extract_strided_slice %3 {offsets = [56, 0], sizes = [8, 128], strides = [1, 1]} : vector<64x128xf32> to vector<8x128xf32>
    %43 = vector.extract_strided_slice %5 {offsets = [0, 0], sizes = [8, 128], strides = [1, 1]} : vector<64x128xf32> to vector<8x128xf32>
    %44 = arith.addf %42, %43 : vector<8x128xf32>
    %45 = vector.broadcast %6 : vector<1x128xf32> to vector<8x128xf32>
    %46 = arith.addf %44, %45 : vector<8x128xf32>
    %c0_10 = arith.constant 0 : index
    %c0_11 = arith.constant 0 : index
    %47 = vector.load %arg5[%c0_10, %c0_11] : memref<32x128xf32, #tpu.memory_space<vmem>>, vector<32x128xf32>
    %cst_12 = arith.constant 0.000000e+00 : f32
    %48 = vector.broadcast %cst_12 : f32 to vector<8x32xf32>
    %cst_13 = arith.constant 0.000000e+00 : f32
    %49 = vector.broadcast %cst_13 : f32 to vector<8x32xf32>
    %cst_14 = arith.constant dense<0.000000e+00> : vector<8x128xf32>
    %50 = tpu.matmul %48, %47, %cst_14 {dimension_numbers = #tpu.dot_dimension_numbers<[1], [0], [0], [1], [0, 0, 1, 1], [], []>} : vector<8x32xf32>, vector<32x128xf32>, vector<8x128xf32> -> vector<8x128xf32>
    %51 = arith.addf %11, %50 : vector<8x128xf32>
    %52 = vector.extract_strided_slice %51 {offsets = [0, 0], sizes = [8, 96], strides = [1, 1]} : vector<8x128xf32> to vector<8x96xf32>
    %53 = arith.negf %52 : vector<8x96xf32>
    %54 = math.exp %53 : vector<8x96xf32>
    %cst_15 = arith.constant 1.000000e+00 : f32
    %55 = vector.broadcast %cst_15 : f32 to vector<8x96xf32>
    %56 = arith.addf %55, %54 : vector<8x96xf32>
    %57 = arith.divf %55, %56 : vector<8x96xf32>
    %58 = vector.extract_strided_slice %51 {offsets = [0, 96], sizes = [8, 32], strides = [1, 1]} : vector<8x128xf32> to vector<8x32xf32>
    %59 = math.tanh %58 : vector<8x32xf32>
    %60 = vector.extract_strided_slice %57 {offsets = [0, 0], sizes = [8, 32], strides = [1, 1]} : vector<8x96xf32> to vector<8x32xf32>
    %61 = vector.extract_strided_slice %57 {offsets = [0, 32], sizes = [8, 32], strides = [1, 1]} : vector<8x96xf32> to vector<8x32xf32>
    %62 = vector.extract_strided_slice %57 {offsets = [0, 64], sizes = [8, 32], strides = [1, 1]} : vector<8x96xf32> to vector<8x32xf32>
    %63 = arith.mulf %61, %49 : vector<8x32xf32>
    %64 = arith.mulf %60, %59 : vector<8x32xf32>
    %65 = arith.addf %63, %64 : vector<8x32xf32>
    %66 = math.tanh %65 : vector<8x32xf32>
    %67 = arith.mulf %62, %66 : vector<8x32xf32>
    %c0_i32 = arith.constant 0 : i32
    %68 = vector.broadcast %c0_i32 : i32 to vector<1x16xi32>
    %c7_i32 = arith.constant 7 : i32
    %69 = vector.broadcast %c7_i32 : i32 to vector<1x16xi32>
    %70 = tpu.concatenate %68, %69 in 1 : vector<1x16xi32>, vector<1x16xi32> -> vector<1x32xi32>
    %71 = vector.broadcast %70 : vector<1x32xi32> to vector<8x32xi32>
    %72 = vector.broadcast %0 : vector<8x1xi32> to vector<8x32xi32>
    %73 = arith.cmpi slt, %71, %72 : vector<8x32xi32>
    %74 = arith.select %73, %67, %48 : vector<8x32xi1>, vector<8x32xf32>
    %75 = arith.select %73, %65, %49 : vector<8x32xi1>, vector<8x32xf32>
    %c0_i32_16 = arith.constant 0 : i32
    %76 = vector.broadcast %c0_i32_16 : i32 to vector<8x1xi32>
    %77 = arith.cmpi sgt, %0, %76 : vector<8x1xi32>
    %c7_i32_17 = arith.constant 7 : i32
    %78 = vector.broadcast %c7_i32_17 : i32 to vector<8x1xi32>
    %79 = arith.cmpi sgt, %0, %78 : vector<8x1xi32>
    %80 = vector.extract_strided_slice %67 {offsets = [0, 0], sizes = [8, 16], strides = [1, 1]} : vector<8x32xf32> to vector<8x16xf32>
    %cst_18 = arith.constant 0.000000e+00 : f32
    %81 = vector.shape_cast %77 : vector<8x1xi1> to vector<8x1xi1>
    %82 = vector.broadcast %81 : vector<8x1xi1> to vector<8x16xi1>
    %83 = vector.broadcast %cst_18 : f32 to vector<8x16xf32>
    %84 = arith.select %82, %80, %83 : vector<8x16xi1>, vector<8x16xf32>
    %85 = vector.extract_strided_slice %67 {offsets = [0, 16], sizes = [8, 16], strides = [1, 1]} : vector<8x32xf32> to vector<8x16xf32>
    %cst_19 = arith.constant 0.000000e+00 : f32
    %86 = vector.shape_cast %79 : vector<8x1xi1> to vector<8x1xi1>
    %87 = vector.broadcast %86 : vector<8x1xi1> to vector<8x16xi1>
    %88 = vector.broadcast %cst_19 : f32 to vector<8x16xf32>
    %89 = arith.select %87, %85, %88 : vector<8x16xi1>, vector<8x16xf32>
    %cst_20 = arith.constant dense<0.000000e+00> : vector<8x128xf32>
    %90 = tpu.matmul %74, %47, %cst_20 {dimension_numbers = #tpu.dot_dimension_numbers<[1], [0], [0], [1], [0, 0, 1, 1], [], []>} : vector<8x32xf32>, vector<32x128xf32>, vector<8x128xf32> -> vector<8x128xf32>
    %91 = arith.addf %16, %90 : vector<8x128xf32>
    %92 = vector.extract_strided_slice %91 {offsets = [0, 0], sizes = [8, 96], strides = [1, 1]} : vector<8x128xf32> to vector<8x96xf32>
    %93 = arith.negf %92 : vector<8x96xf32>
    %94 = math.exp %93 : vector<8x96xf32>
    %cst_21 = arith.constant 1.000000e+00 : f32
    %95 = vector.broadcast %cst_21 : f32 to vector<8x96xf32>
    %96 = arith.addf %95, %94 : vector<8x96xf32>
    %97 = arith.divf %95, %96 : vector<8x96xf32>
    %98 = vector.extract_strided_slice %91 {offsets = [0, 96], sizes = [8, 32], strides = [1, 1]} : vector<8x128xf32> to vector<8x32xf32>
    %99 = math.tanh %98 : vector<8x32xf32>
    %100 = vector.extract_strided_slice %97 {offsets = [0, 0], sizes = [8, 32], strides = [1, 1]} : vector<8x96xf32> to vector<8x32xf32>
    %101 = vector.extract_strided_slice %97 {offsets = [0, 32], sizes = [8, 32], strides = [1, 1]} : vector<8x96xf32> to vector<8x32xf32>
    %102 = vector.extract_strided_slice %97 {offsets = [0, 64], sizes = [8, 32], strides = [1, 1]} : vector<8x96xf32> to vector<8x32xf32>
    %103 = arith.mulf %101, %75 : vector<8x32xf32>
    %104 = arith.mulf %100, %99 : vector<8x32xf32>
    %105 = arith.addf %103, %104 : vector<8x32xf32>
    %106 = math.tanh %105 : vector<8x32xf32>
    %107 = arith.mulf %102, %106 : vector<8x32xf32>
    %c1_i32 = arith.constant 1 : i32
    %108 = vector.broadcast %c1_i32 : i32 to vector<1x16xi32>
    %c6_i32 = arith.constant 6 : i32
    %109 = vector.broadcast %c6_i32 : i32 to vector<1x16xi32>
    %110 = tpu.concatenate %108, %109 in 1 : vector<1x16xi32>, vector<1x16xi32> -> vector<1x32xi32>
    %111 = vector.broadcast %110 : vector<1x32xi32> to vector<8x32xi32>
    %112 = vector.broadcast %0 : vector<8x1xi32> to vector<8x32xi32>
    %113 = arith.cmpi slt, %111, %112 : vector<8x32xi32>
    %114 = arith.select %113, %107, %74 : vector<8x32xi1>, vector<8x32xf32>
    %115 = arith.select %113, %105, %75 : vector<8x32xi1>, vector<8x32xf32>
    %c1_i32_22 = arith.constant 1 : i32
    %116 = vector.broadcast %c1_i32_22 : i32 to vector<8x1xi32>
    %117 = arith.cmpi sgt, %0, %116 : vector<8x1xi32>
    %c6_i32_23 = arith.constant 6 : i32
    %118 = vector.broadcast %c6_i32_23 : i32 to vector<8x1xi32>
    %119 = arith.cmpi sgt, %0, %118 : vector<8x1xi32>
    %120 = vector.extract_strided_slice %107 {offsets = [0, 0], sizes = [8, 16], strides = [1, 1]} : vector<8x32xf32> to vector<8x16xf32>
    %cst_24 = arith.constant 0.000000e+00 : f32
    %121 = vector.shape_cast %117 : vector<8x1xi1> to vector<8x1xi1>
    %122 = vector.broadcast %121 : vector<8x1xi1> to vector<8x16xi1>
    %123 = vector.broadcast %cst_24 : f32 to vector<8x16xf32>
    %124 = arith.select %122, %120, %123 : vector<8x16xi1>, vector<8x16xf32>
    %125 = vector.extract_strided_slice %107 {offsets = [0, 16], sizes = [8, 16], strides = [1, 1]} : vector<8x32xf32> to vector<8x16xf32>
    %cst_25 = arith.constant 0.000000e+00 : f32
    %126 = vector.shape_cast %119 : vector<8x1xi1> to vector<8x1xi1>
    %127 = vector.broadcast %126 : vector<8x1xi1> to vector<8x16xi1>
    %128 = vector.broadcast %cst_25 : f32 to vector<8x16xf32>
    %129 = arith.select %127, %125, %128 : vector<8x16xi1>, vector<8x16xf32>
    %cst_26 = arith.constant dense<0.000000e+00> : vector<8x128xf32>
    %130 = tpu.matmul %114, %47, %cst_26 {dimension_numbers = #tpu.dot_dimension_numbers<[1], [0], [0], [1], [0, 0, 1, 1], [], []>} : vector<8x32xf32>, vector<32x128xf32>, vector<8x128xf32> -> vector<8x128xf32>
    %131 = arith.addf %21, %130 : vector<8x128xf32>
    %132 = vector.extract_strided_slice %131 {offsets = [0, 0], sizes = [8, 96], strides = [1, 1]} : vector<8x128xf32> to vector<8x96xf32>
    %133 = arith.negf %132 : vector<8x96xf32>
    %134 = math.exp %133 : vector<8x96xf32>
    %cst_27 = arith.constant 1.000000e+00 : f32
    %135 = vector.broadcast %cst_27 : f32 to vector<8x96xf32>
    %136 = arith.addf %135, %134 : vector<8x96xf32>
    %137 = arith.divf %135, %136 : vector<8x96xf32>
    %138 = vector.extract_strided_slice %131 {offsets = [0, 96], sizes = [8, 32], strides = [1, 1]} : vector<8x128xf32> to vector<8x32xf32>
    %139 = math.tanh %138 : vector<8x32xf32>
    %140 = vector.extract_strided_slice %137 {offsets = [0, 0], sizes = [8, 32], strides = [1, 1]} : vector<8x96xf32> to vector<8x32xf32>
    %141 = vector.extract_strided_slice %137 {offsets = [0, 32], sizes = [8, 32], strides = [1, 1]} : vector<8x96xf32> to vector<8x32xf32>
    %142 = vector.extract_strided_slice %137 {offsets = [0, 64], sizes = [8, 32], strides = [1, 1]} : vector<8x96xf32> to vector<8x32xf32>
    %143 = arith.mulf %141, %115 : vector<8x32xf32>
    %144 = arith.mulf %140, %139 : vector<8x32xf32>
    %145 = arith.addf %143, %144 : vector<8x32xf32>
    %146 = math.tanh %145 : vector<8x32xf32>
    %147 = arith.mulf %142, %146 : vector<8x32xf32>
    %c2_i32 = arith.constant 2 : i32
    %148 = vector.broadcast %c2_i32 : i32 to vector<1x16xi32>
    %c5_i32 = arith.constant 5 : i32
    %149 = vector.broadcast %c5_i32 : i32 to vector<1x16xi32>
    %150 = tpu.concatenate %148, %149 in 1 : vector<1x16xi32>, vector<1x16xi32> -> vector<1x32xi32>
    %151 = vector.broadcast %150 : vector<1x32xi32> to vector<8x32xi32>
    %152 = vector.broadcast %0 : vector<8x1xi32> to vector<8x32xi32>
    %153 = arith.cmpi slt, %151, %152 : vector<8x32xi32>
    %154 = arith.select %153, %147, %114 : vector<8x32xi1>, vector<8x32xf32>
    %155 = arith.select %153, %145, %115 : vector<8x32xi1>, vector<8x32xf32>
    %c2_i32_28 = arith.constant 2 : i32
    %156 = vector.broadcast %c2_i32_28 : i32 to vector<8x1xi32>
    %157 = arith.cmpi sgt, %0, %156 : vector<8x1xi32>
    %c5_i32_29 = arith.constant 5 : i32
    %158 = vector.broadcast %c5_i32_29 : i32 to vector<8x1xi32>
    %159 = arith.cmpi sgt, %0, %158 : vector<8x1xi32>
    %160 = vector.extract_strided_slice %147 {offsets = [0, 0], sizes = [8, 16], strides = [1, 1]} : vector<8x32xf32> to vector<8x16xf32>
    %cst_30 = arith.constant 0.000000e+00 : f32
    %161 = vector.shape_cast %157 : vector<8x1xi1> to vector<8x1xi1>
    %162 = vector.broadcast %161 : vector<8x1xi1> to vector<8x16xi1>
    %163 = vector.broadcast %cst_30 : f32 to vector<8x16xf32>
    %164 = arith.select %162, %160, %163 : vector<8x16xi1>, vector<8x16xf32>
    %165 = vector.extract_strided_slice %147 {offsets = [0, 16], sizes = [8, 16], strides = [1, 1]} : vector<8x32xf32> to vector<8x16xf32>
    %cst_31 = arith.constant 0.000000e+00 : f32
    %166 = vector.shape_cast %159 : vector<8x1xi1> to vector<8x1xi1>
    %167 = vector.broadcast %166 : vector<8x1xi1> to vector<8x16xi1>
    %168 = vector.broadcast %cst_31 : f32 to vector<8x16xf32>
    %169 = arith.select %167, %165, %168 : vector<8x16xi1>, vector<8x16xf32>
    %cst_32 = arith.constant dense<0.000000e+00> : vector<8x128xf32>
    %170 = tpu.matmul %154, %47, %cst_32 {dimension_numbers = #tpu.dot_dimension_numbers<[1], [0], [0], [1], [0, 0, 1, 1], [], []>} : vector<8x32xf32>, vector<32x128xf32>, vector<8x128xf32> -> vector<8x128xf32>
    %171 = arith.addf %26, %170 : vector<8x128xf32>
    %172 = vector.extract_strided_slice %171 {offsets = [0, 0], sizes = [8, 96], strides = [1, 1]} : vector<8x128xf32> to vector<8x96xf32>
    %173 = arith.negf %172 : vector<8x96xf32>
    %174 = math.exp %173 : vector<8x96xf32>
    %cst_33 = arith.constant 1.000000e+00 : f32
    %175 = vector.broadcast %cst_33 : f32 to vector<8x96xf32>
    %176 = arith.addf %175, %174 : vector<8x96xf32>
    %177 = arith.divf %175, %176 : vector<8x96xf32>
    %178 = vector.extract_strided_slice %171 {offsets = [0, 96], sizes = [8, 32], strides = [1, 1]} : vector<8x128xf32> to vector<8x32xf32>
    %179 = math.tanh %178 : vector<8x32xf32>
    %180 = vector.extract_strided_slice %177 {offsets = [0, 0], sizes = [8, 32], strides = [1, 1]} : vector<8x96xf32> to vector<8x32xf32>
    %181 = vector.extract_strided_slice %177 {offsets = [0, 32], sizes = [8, 32], strides = [1, 1]} : vector<8x96xf32> to vector<8x32xf32>
    %182 = vector.extract_strided_slice %177 {offsets = [0, 64], sizes = [8, 32], strides = [1, 1]} : vector<8x96xf32> to vector<8x32xf32>
    %183 = arith.mulf %181, %155 : vector<8x32xf32>
    %184 = arith.mulf %180, %179 : vector<8x32xf32>
    %185 = arith.addf %183, %184 : vector<8x32xf32>
    %186 = math.tanh %185 : vector<8x32xf32>
    %187 = arith.mulf %182, %186 : vector<8x32xf32>
    %c3_i32 = arith.constant 3 : i32
    %188 = vector.broadcast %c3_i32 : i32 to vector<1x16xi32>
    %c4_i32 = arith.constant 4 : i32
    %189 = vector.broadcast %c4_i32 : i32 to vector<1x16xi32>
    %190 = tpu.concatenate %188, %189 in 1 : vector<1x16xi32>, vector<1x16xi32> -> vector<1x32xi32>
    %191 = vector.broadcast %190 : vector<1x32xi32> to vector<8x32xi32>
    %192 = vector.broadcast %0 : vector<8x1xi32> to vector<8x32xi32>
    %193 = arith.cmpi slt, %191, %192 : vector<8x32xi32>
    %194 = arith.select %193, %187, %154 : vector<8x32xi1>, vector<8x32xf32>
    %195 = arith.select %193, %185, %155 : vector<8x32xi1>, vector<8x32xf32>
    %c3_i32_34 = arith.constant 3 : i32
    %196 = vector.broadcast %c3_i32_34 : i32 to vector<8x1xi32>
    %197 = arith.cmpi sgt, %0, %196 : vector<8x1xi32>
    %c4_i32_35 = arith.constant 4 : i32
    %198 = vector.broadcast %c4_i32_35 : i32 to vector<8x1xi32>
    %199 = arith.cmpi sgt, %0, %198 : vector<8x1xi32>
    %200 = vector.extract_strided_slice %187 {offsets = [0, 0], sizes = [8, 16], strides = [1, 1]} : vector<8x32xf32> to vector<8x16xf32>
    %cst_36 = arith.constant 0.000000e+00 : f32
    %201 = vector.shape_cast %197 : vector<8x1xi1> to vector<8x1xi1>
    %202 = vector.broadcast %201 : vector<8x1xi1> to vector<8x16xi1>
    %203 = vector.broadcast %cst_36 : f32 to vector<8x16xf32>
    %204 = arith.select %202, %200, %203 : vector<8x16xi1>, vector<8x16xf32>
    %205 = vector.extract_strided_slice %187 {offsets = [0, 16], sizes = [8, 16], strides = [1, 1]} : vector<8x32xf32> to vector<8x16xf32>
    %cst_37 = arith.constant 0.000000e+00 : f32
    %206 = vector.shape_cast %199 : vector<8x1xi1> to vector<8x1xi1>
    %207 = vector.broadcast %206 : vector<8x1xi1> to vector<8x16xi1>
    %208 = vector.broadcast %cst_37 : f32 to vector<8x16xf32>
    %209 = arith.select %207, %205, %208 : vector<8x16xi1>, vector<8x16xf32>
    %cst_38 = arith.constant dense<0.000000e+00> : vector<8x128xf32>
    %210 = tpu.matmul %194, %47, %cst_38 {dimension_numbers = #tpu.dot_dimension_numbers<[1], [0], [0], [1], [0, 0, 1, 1], [], []>} : vector<8x32xf32>, vector<32x128xf32>, vector<8x128xf32> -> vector<8x128xf32>
    %211 = arith.addf %31, %210 : vector<8x128xf32>
    %212 = vector.extract_strided_slice %211 {offsets = [0, 0], sizes = [8, 96], strides = [1, 1]} : vector<8x128xf32> to vector<8x96xf32>
    %213 = arith.negf %212 : vector<8x96xf32>
    %214 = math.exp %213 : vector<8x96xf32>
    %cst_39 = arith.constant 1.000000e+00 : f32
    %215 = vector.broadcast %cst_39 : f32 to vector<8x96xf32>
    %216 = arith.addf %215, %214 : vector<8x96xf32>
    %217 = arith.divf %215, %216 : vector<8x96xf32>
    %218 = vector.extract_strided_slice %211 {offsets = [0, 96], sizes = [8, 32], strides = [1, 1]} : vector<8x128xf32> to vector<8x32xf32>
    %219 = math.tanh %218 : vector<8x32xf32>
    %220 = vector.extract_strided_slice %217 {offsets = [0, 0], sizes = [8, 32], strides = [1, 1]} : vector<8x96xf32> to vector<8x32xf32>
    %221 = vector.extract_strided_slice %217 {offsets = [0, 32], sizes = [8, 32], strides = [1, 1]} : vector<8x96xf32> to vector<8x32xf32>
    %222 = vector.extract_strided_slice %217 {offsets = [0, 64], sizes = [8, 32], strides = [1, 1]} : vector<8x96xf32> to vector<8x32xf32>
    %223 = arith.mulf %221, %195 : vector<8x32xf32>
    %224 = arith.mulf %220, %219 : vector<8x32xf32>
    %225 = arith.addf %223, %224 : vector<8x32xf32>
    %226 = math.tanh %225 : vector<8x32xf32>
    %227 = arith.mulf %222, %226 : vector<8x32xf32>
    %c4_i32_40 = arith.constant 4 : i32
    %228 = vector.broadcast %c4_i32_40 : i32 to vector<1x16xi32>
    %c3_i32_41 = arith.constant 3 : i32
    %229 = vector.broadcast %c3_i32_41 : i32 to vector<1x16xi32>
    %230 = tpu.concatenate %228, %229 in 1 : vector<1x16xi32>, vector<1x16xi32> -> vector<1x32xi32>
    %231 = vector.broadcast %230 : vector<1x32xi32> to vector<8x32xi32>
    %232 = vector.broadcast %0 : vector<8x1xi32> to vector<8x32xi32>
    %233 = arith.cmpi slt, %231, %232 : vector<8x32xi32>
    %234 = arith.select %233, %227, %194 : vector<8x32xi1>, vector<8x32xf32>
    %235 = arith.select %233, %225, %195 : vector<8x32xi1>, vector<8x32xf32>
    %c4_i32_42 = arith.constant 4 : i32
    %236 = vector.broadcast %c4_i32_42 : i32 to vector<8x1xi32>
    %237 = arith.cmpi sgt, %0, %236 : vector<8x1xi32>
    %c3_i32_43 = arith.constant 3 : i32
    %238 = vector.broadcast %c3_i32_43 : i32 to vector<8x1xi32>
    %239 = arith.cmpi sgt, %0, %238 : vector<8x1xi32>
    %240 = vector.extract_strided_slice %227 {offsets = [0, 0], sizes = [8, 16], strides = [1, 1]} : vector<8x32xf32> to vector<8x16xf32>
    %cst_44 = arith.constant 0.000000e+00 : f32
    %241 = vector.shape_cast %237 : vector<8x1xi1> to vector<8x1xi1>
    %242 = vector.broadcast %241 : vector<8x1xi1> to vector<8x16xi1>
    %243 = vector.broadcast %cst_44 : f32 to vector<8x16xf32>
    %244 = arith.select %242, %240, %243 : vector<8x16xi1>, vector<8x16xf32>
    %245 = vector.extract_strided_slice %227 {offsets = [0, 16], sizes = [8, 16], strides = [1, 1]} : vector<8x32xf32> to vector<8x16xf32>
    %cst_45 = arith.constant 0.000000e+00 : f32
    %246 = vector.shape_cast %239 : vector<8x1xi1> to vector<8x1xi1>
    %247 = vector.broadcast %246 : vector<8x1xi1> to vector<8x16xi1>
    %248 = vector.broadcast %cst_45 : f32 to vector<8x16xf32>
    %249 = arith.select %247, %245, %248 : vector<8x16xi1>, vector<8x16xf32>
    %cst_46 = arith.constant dense<0.000000e+00> : vector<8x128xf32>
    %250 = tpu.matmul %234, %47, %cst_46 {dimension_numbers = #tpu.dot_dimension_numbers<[1], [0], [0], [1], [0, 0, 1, 1], [], []>} : vector<8x32xf32>, vector<32x128xf32>, vector<8x128xf32> -> vector<8x128xf32>
    %251 = arith.addf %36, %250 : vector<8x128xf32>
    %252 = vector.extract_strided_slice %251 {offsets = [0, 0], sizes = [8, 96], strides = [1, 1]} : vector<8x128xf32> to vector<8x96xf32>
    %253 = arith.negf %252 : vector<8x96xf32>
    %254 = math.exp %253 : vector<8x96xf32>
    %cst_47 = arith.constant 1.000000e+00 : f32
    %255 = vector.broadcast %cst_47 : f32 to vector<8x96xf32>
    %256 = arith.addf %255, %254 : vector<8x96xf32>
    %257 = arith.divf %255, %256 : vector<8x96xf32>
    %258 = vector.extract_strided_slice %251 {offsets = [0, 96], sizes = [8, 32], strides = [1, 1]} : vector<8x128xf32> to vector<8x32xf32>
    %259 = math.tanh %258 : vector<8x32xf32>
    %260 = vector.extract_strided_slice %257 {offsets = [0, 0], sizes = [8, 32], strides = [1, 1]} : vector<8x96xf32> to vector<8x32xf32>
    %261 = vector.extract_strided_slice %257 {offsets = [0, 32], sizes = [8, 32], strides = [1, 1]} : vector<8x96xf32> to vector<8x32xf32>
    %262 = vector.extract_strided_slice %257 {offsets = [0, 64], sizes = [8, 32], strides = [1, 1]} : vector<8x96xf32> to vector<8x32xf32>
    %263 = arith.mulf %261, %235 : vector<8x32xf32>
    %264 = arith.mulf %260, %259 : vector<8x32xf32>
    %265 = arith.addf %263, %264 : vector<8x32xf32>
    %266 = math.tanh %265 : vector<8x32xf32>
    %267 = arith.mulf %262, %266 : vector<8x32xf32>
    %c5_i32_48 = arith.constant 5 : i32
    %268 = vector.broadcast %c5_i32_48 : i32 to vector<1x16xi32>
    %c2_i32_49 = arith.constant 2 : i32
    %269 = vector.broadcast %c2_i32_49 : i32 to vector<1x16xi32>
    %270 = tpu.concatenate %268, %269 in 1 : vector<1x16xi32>, vector<1x16xi32> -> vector<1x32xi32>
    %271 = vector.broadcast %270 : vector<1x32xi32> to vector<8x32xi32>
    %272 = vector.broadcast %0 : vector<8x1xi32> to vector<8x32xi32>
    %273 = arith.cmpi slt, %271, %272 : vector<8x32xi32>
    %274 = arith.select %273, %267, %234 : vector<8x32xi1>, vector<8x32xf32>
    %275 = arith.select %273, %265, %235 : vector<8x32xi1>, vector<8x32xf32>
    %c5_i32_50 = arith.constant 5 : i32
    %276 = vector.broadcast %c5_i32_50 : i32 to vector<8x1xi32>
    %277 = arith.cmpi sgt, %0, %276 : vector<8x1xi32>
    %c2_i32_51 = arith.constant 2 : i32
    %278 = vector.broadcast %c2_i32_51 : i32 to vector<8x1xi32>
    %279 = arith.cmpi sgt, %0, %278 : vector<8x1xi32>
    %280 = vector.extract_strided_slice %267 {offsets = [0, 0], sizes = [8, 16], strides = [1, 1]} : vector<8x32xf32> to vector<8x16xf32>
    %cst_52 = arith.constant 0.000000e+00 : f32
    %281 = vector.shape_cast %277 : vector<8x1xi1> to vector<8x1xi1>
    %282 = vector.broadcast %281 : vector<8x1xi1> to vector<8x16xi1>
    %283 = vector.broadcast %cst_52 : f32 to vector<8x16xf32>
    %284 = arith.select %282, %280, %283 : vector<8x16xi1>, vector<8x16xf32>
    %285 = vector.extract_strided_slice %267 {offsets = [0, 16], sizes = [8, 16], strides = [1, 1]} : vector<8x32xf32> to vector<8x16xf32>
    %cst_53 = arith.constant 0.000000e+00 : f32
    %286 = vector.shape_cast %279 : vector<8x1xi1> to vector<8x1xi1>
    %287 = vector.broadcast %286 : vector<8x1xi1> to vector<8x16xi1>
    %288 = vector.broadcast %cst_53 : f32 to vector<8x16xf32>
    %289 = arith.select %287, %285, %288 : vector<8x16xi1>, vector<8x16xf32>
    %cst_54 = arith.constant dense<0.000000e+00> : vector<8x128xf32>
    %290 = tpu.matmul %274, %47, %cst_54 {dimension_numbers = #tpu.dot_dimension_numbers<[1], [0], [0], [1], [0, 0, 1, 1], [], []>} : vector<8x32xf32>, vector<32x128xf32>, vector<8x128xf32> -> vector<8x128xf32>
    %291 = arith.addf %41, %290 : vector<8x128xf32>
    %292 = vector.extract_strided_slice %291 {offsets = [0, 0], sizes = [8, 96], strides = [1, 1]} : vector<8x128xf32> to vector<8x96xf32>
    %293 = arith.negf %292 : vector<8x96xf32>
    %294 = math.exp %293 : vector<8x96xf32>
    %cst_55 = arith.constant 1.000000e+00 : f32
    %295 = vector.broadcast %cst_55 : f32 to vector<8x96xf32>
    %296 = arith.addf %295, %294 : vector<8x96xf32>
    %297 = arith.divf %295, %296 : vector<8x96xf32>
    %298 = vector.extract_strided_slice %291 {offsets = [0, 96], sizes = [8, 32], strides = [1, 1]} : vector<8x128xf32> to vector<8x32xf32>
    %299 = math.tanh %298 : vector<8x32xf32>
    %300 = vector.extract_strided_slice %297 {offsets = [0, 0], sizes = [8, 32], strides = [1, 1]} : vector<8x96xf32> to vector<8x32xf32>
    %301 = vector.extract_strided_slice %297 {offsets = [0, 32], sizes = [8, 32], strides = [1, 1]} : vector<8x96xf32> to vector<8x32xf32>
    %302 = vector.extract_strided_slice %297 {offsets = [0, 64], sizes = [8, 32], strides = [1, 1]} : vector<8x96xf32> to vector<8x32xf32>
    %303 = arith.mulf %301, %275 : vector<8x32xf32>
    %304 = arith.mulf %300, %299 : vector<8x32xf32>
    %305 = arith.addf %303, %304 : vector<8x32xf32>
    %306 = math.tanh %305 : vector<8x32xf32>
    %307 = arith.mulf %302, %306 : vector<8x32xf32>
    %c6_i32_56 = arith.constant 6 : i32
    %308 = vector.broadcast %c6_i32_56 : i32 to vector<1x16xi32>
    %c1_i32_57 = arith.constant 1 : i32
    %309 = vector.broadcast %c1_i32_57 : i32 to vector<1x16xi32>
    %310 = tpu.concatenate %308, %309 in 1 : vector<1x16xi32>, vector<1x16xi32> -> vector<1x32xi32>
    %311 = vector.broadcast %310 : vector<1x32xi32> to vector<8x32xi32>
    %312 = vector.broadcast %0 : vector<8x1xi32> to vector<8x32xi32>
    %313 = arith.cmpi slt, %311, %312 : vector<8x32xi32>
    %314 = arith.select %313, %307, %274 : vector<8x32xi1>, vector<8x32xf32>
    %315 = arith.select %313, %305, %275 : vector<8x32xi1>, vector<8x32xf32>
    %c6_i32_58 = arith.constant 6 : i32
    %316 = vector.broadcast %c6_i32_58 : i32 to vector<8x1xi32>
    %317 = arith.cmpi sgt, %0, %316 : vector<8x1xi32>
    %c1_i32_59 = arith.constant 1 : i32
    %318 = vector.broadcast %c1_i32_59 : i32 to vector<8x1xi32>
    %319 = arith.cmpi sgt, %0, %318 : vector<8x1xi32>
    %320 = vector.extract_strided_slice %307 {offsets = [0, 0], sizes = [8, 16], strides = [1, 1]} : vector<8x32xf32> to vector<8x16xf32>
    %cst_60 = arith.constant 0.000000e+00 : f32
    %321 = vector.shape_cast %317 : vector<8x1xi1> to vector<8x1xi1>
    %322 = vector.broadcast %321 : vector<8x1xi1> to vector<8x16xi1>
    %323 = vector.broadcast %cst_60 : f32 to vector<8x16xf32>
    %324 = arith.select %322, %320, %323 : vector<8x16xi1>, vector<8x16xf32>
    %325 = vector.extract_strided_slice %307 {offsets = [0, 16], sizes = [8, 16], strides = [1, 1]} : vector<8x32xf32> to vector<8x16xf32>
    %cst_61 = arith.constant 0.000000e+00 : f32
    %326 = vector.shape_cast %319 : vector<8x1xi1> to vector<8x1xi1>
    %327 = vector.broadcast %326 : vector<8x1xi1> to vector<8x16xi1>
    %328 = vector.broadcast %cst_61 : f32 to vector<8x16xf32>
    %329 = arith.select %327, %325, %328 : vector<8x16xi1>, vector<8x16xf32>
    %cst_62 = arith.constant dense<0.000000e+00> : vector<8x128xf32>
    %330 = tpu.matmul %314, %47, %cst_62 {dimension_numbers = #tpu.dot_dimension_numbers<[1], [0], [0], [1], [0, 0, 1, 1], [], []>} : vector<8x32xf32>, vector<32x128xf32>, vector<8x128xf32> -> vector<8x128xf32>
    %331 = arith.addf %46, %330 : vector<8x128xf32>
    %332 = vector.extract_strided_slice %331 {offsets = [0, 0], sizes = [8, 96], strides = [1, 1]} : vector<8x128xf32> to vector<8x96xf32>
    %333 = arith.negf %332 : vector<8x96xf32>
    %334 = math.exp %333 : vector<8x96xf32>
    %cst_63 = arith.constant 1.000000e+00 : f32
    %335 = vector.broadcast %cst_63 : f32 to vector<8x96xf32>
    %336 = arith.addf %335, %334 : vector<8x96xf32>
    %337 = arith.divf %335, %336 : vector<8x96xf32>
    %338 = vector.extract_strided_slice %331 {offsets = [0, 96], sizes = [8, 32], strides = [1, 1]} : vector<8x128xf32> to vector<8x32xf32>
    %339 = math.tanh %338 : vector<8x32xf32>
    %340 = vector.extract_strided_slice %337 {offsets = [0, 0], sizes = [8, 32], strides = [1, 1]} : vector<8x96xf32> to vector<8x32xf32>
    %341 = vector.extract_strided_slice %337 {offsets = [0, 32], sizes = [8, 32], strides = [1, 1]} : vector<8x96xf32> to vector<8x32xf32>
    %342 = vector.extract_strided_slice %337 {offsets = [0, 64], sizes = [8, 32], strides = [1, 1]} : vector<8x96xf32> to vector<8x32xf32>
    %343 = arith.mulf %341, %315 : vector<8x32xf32>
    %344 = arith.mulf %340, %339 : vector<8x32xf32>
    %345 = arith.addf %343, %344 : vector<8x32xf32>
    %346 = math.tanh %345 : vector<8x32xf32>
    %347 = arith.mulf %342, %346 : vector<8x32xf32>
    %c7_i32_64 = arith.constant 7 : i32
    %348 = vector.broadcast %c7_i32_64 : i32 to vector<1x16xi32>
    %c0_i32_65 = arith.constant 0 : i32
    %349 = vector.broadcast %c0_i32_65 : i32 to vector<1x16xi32>
    %350 = tpu.concatenate %348, %349 in 1 : vector<1x16xi32>, vector<1x16xi32> -> vector<1x32xi32>
    %351 = vector.broadcast %350 : vector<1x32xi32> to vector<8x32xi32>
    %352 = vector.broadcast %0 : vector<8x1xi32> to vector<8x32xi32>
    %353 = arith.cmpi slt, %351, %352 : vector<8x32xi32>
    %354 = arith.select %353, %347, %314 : vector<8x32xi1>, vector<8x32xf32>
    %355 = arith.select %353, %345, %315 : vector<8x32xi1>, vector<8x32xf32>
    %c7_i32_66 = arith.constant 7 : i32
    %356 = vector.broadcast %c7_i32_66 : i32 to vector<8x1xi32>
    %357 = arith.cmpi sgt, %0, %356 : vector<8x1xi32>
    %c0_i32_67 = arith.constant 0 : i32
    %358 = vector.broadcast %c0_i32_67 : i32 to vector<8x1xi32>
    %359 = arith.cmpi sgt, %0, %358 : vector<8x1xi32>
    %360 = vector.extract_strided_slice %347 {offsets = [0, 0], sizes = [8, 16], strides = [1, 1]} : vector<8x32xf32> to vector<8x16xf32>
    %cst_68 = arith.constant 0.000000e+00 : f32
    %361 = vector.shape_cast %357 : vector<8x1xi1> to vector<8x1xi1>
    %362 = vector.broadcast %361 : vector<8x1xi1> to vector<8x16xi1>
    %363 = vector.broadcast %cst_68 : f32 to vector<8x16xf32>
    %364 = arith.select %362, %360, %363 : vector<8x16xi1>, vector<8x16xf32>
    %365 = vector.extract_strided_slice %347 {offsets = [0, 16], sizes = [8, 16], strides = [1, 1]} : vector<8x32xf32> to vector<8x16xf32>
    %cst_69 = arith.constant 0.000000e+00 : f32
    %366 = vector.shape_cast %359 : vector<8x1xi1> to vector<8x1xi1>
    %367 = vector.broadcast %366 : vector<8x1xi1> to vector<8x16xi1>
    %368 = vector.broadcast %cst_69 : f32 to vector<8x16xf32>
    %369 = arith.select %367, %365, %368 : vector<8x16xi1>, vector<8x16xf32>
    %370 = tpu.concatenate %84, %369 in 1 : vector<8x16xf32>, vector<8x16xf32> -> vector<8x32xf32>
    %371 = tpu.concatenate %124, %329 in 1 : vector<8x16xf32>, vector<8x16xf32> -> vector<8x32xf32>
    %372 = tpu.concatenate %164, %289 in 1 : vector<8x16xf32>, vector<8x16xf32> -> vector<8x32xf32>
    %373 = tpu.concatenate %204, %249 in 1 : vector<8x16xf32>, vector<8x16xf32> -> vector<8x32xf32>
    %374 = tpu.concatenate %244, %209 in 1 : vector<8x16xf32>, vector<8x16xf32> -> vector<8x32xf32>
    %375 = tpu.concatenate %284, %169 in 1 : vector<8x16xf32>, vector<8x16xf32> -> vector<8x32xf32>
    %376 = tpu.concatenate %324, %129 in 1 : vector<8x16xf32>, vector<8x16xf32> -> vector<8x32xf32>
    %377 = tpu.concatenate %364, %89 in 1 : vector<8x16xf32>, vector<8x16xf32> -> vector<8x32xf32>
    %378 = tpu.concatenate %370, %371, %372, %373, %374, %375, %376, %377 in 1 : vector<8x32xf32>, vector<8x32xf32>, vector<8x32xf32>, vector<8x32xf32>, vector<8x32xf32>, vector<8x32xf32>, vector<8x32xf32>, vector<8x32xf32> -> vector<8x256xf32>
    %c0_70 = arith.constant 0 : index
    %c0_71 = arith.constant 0 : index
    %379 = vector.load %arg6[%c0_70, %c0_71] : memref<8x256xf32, #tpu.memory_space<vmem>>, vector<8x256xf32>
    tpu.vector_store %arg6[%c0_70, %c0_71], %378 {strides = array<i32>} : memref<8x256xf32, #tpu.memory_space<vmem>>, vector<8x256xf32>,
    %c0_72 = arith.constant 0 : index
    %c0_73 = arith.constant 0 : index
    %380 = vector.load %arg7[%c0_72, %c0_73] : memref<8x32xf32, #tpu.memory_space<vmem>>, vector<8x32xf32>
    tpu.vector_store %arg7[%c0_72, %c0_73], %354 {strides = array<i32>} : memref<8x32xf32, #tpu.memory_space<vmem>>, vector<8x32xf32>,
    %c0_74 = arith.constant 0 : index
    %c0_75 = arith.constant 0 : index
    %381 = vector.load %arg8[%c0_74, %c0_75] : memref<8x32xf32, #tpu.memory_space<vmem>>, vector<8x32xf32>
    tpu.vector_store %arg8[%c0_74, %c0_75], %355 {strides = array<i32>} : memref<8x32xf32, #tpu.memory_space<vmem>>, vector<8x32xf32>,
    return
  }
}

</mosaic_0001>

<bundles_post_ra>
// kernel: rnn_layer_forward.1
= control target key start
LH: loop header
LB: loop body
LE: loop exit
PB: predicated region body
PF: predicated region fallthrough
CT: control target
= control target key end

     0   :  { %vm37_vm0 = vcmask 130048   ;;  %v1720_v8 = vmov 0.0   ;;  %vm1721_vm1 = vmmov 0   ;;  %v1723_v60 = vmov 0   ;;  %s1724_s15 = smov 96   ;;  %s1725_s16 = smov 64   ;;  %s2170_s2 = inlined_call_operand.vmem [shape: f32[16,128], index: 2, kind: input, shape index: {}]   ;;  %s2171_s3 = inlined_call_operand.vmem [shape: f32[16,128], index: 3, kind: input, shape index: {}]   ;;  %s2172_s0 = inlined_call_operand.vmem [shape: f32[64,16], index: 0, kind: input, shape index: {}]   ;;  %s2173_s5 = inlined_call_operand.vmem [shape: f32[32,128], index: 5, kind: input, shape index: {}]   ;;  %s2174_s4 = inlined_call_operand.vmem [shape: f32[1,128], index: 4, kind: input, shape index: {}]   ;;  %s2175_s1 = inlined_call_operand.vmem [shape: s32[8,1], index: 1, kind: input, shape index: {}]   ;;  %s2176_s7 = inlined_call_operand.vmem [shape: f32[8,32], index: 7, kind: output, shape index: {1}]   ;;  %s2177_s8 = inlined_call_operand.vmem [shape: f32[8,32], index: 8, kind: output, shape index: {2}]   ;;  %s2178_s6 = inlined_call_operand.vmem [shape: f32[8,256], index: 6, kind: output, shape index: {0}]  }
   0x1   :  { %v36_v0 = vld [vmem:[%s2170_s2 + $0x8] sm:$0xff]  ;;  %v35_v2 = vld [vmem:[%s2170_s2] sm:$0xff]  ;;  %v29_v6 = vld [vmem:[%s2172_s0 + $0x10] sm:$0xff]  ;;  %1654 = vset.pattern.permute.xlu1 %v1723_v60  ;;  %1655 = vset.pattern.permute.xlu0 %v1723_v60  ;;  %vm301_vm3 = vcmask 261120  }
   0x2   :  { %v168_v1 = vld [vmem:[%s2171_s3 + $0x8] sm:$0xff]  ;;  %1521 = vmatprep.subr.mxu0 %v36_v0  ;;  %v167_v3 = vld [vmem:[%s2171_s3] sm:$0xff]  ;;  %v1804_v7 = vld [vmem:[%s2173_s5 + $0x18] sm:$0xff] }
   0x3   :  { %1537 = vmatprep.subr.mxu1 %v168_v1  ;;  %v27_v4 = vld [vmem:[%s2172_s0] sm:$0xff]  ;;  %1522 = vmatpush3.msra.mxu0 %v36_v0  ;;  %v28_v5 = vld [vmem:[%s2172_s0 + $0x8] sm:$0xff]  ;;  %v30_v9 = vld [vmem:[%s2172_s0 + $0x18] sm:$0xff] }
   0x4   :  { %1538 = vmatpush3.msra.mxu1 %v168_v1  ;;  %1523 = vmatprep.subr.mxu0 %v35_v2  ;;  %v1818_v10 = vld [vmem:[%s2173_s5 + $0x10] sm:$0xff]  ;;  %v31_v11 = vld [vmem:[%s2172_s0 + $0x20] sm:$0xff]  ;;  %v1830_v12 = vld [vmem:[%s2173_s5 + $0x8] sm:$0xff] }
   0x5   :  { %1539 = vmatprep.subr.mxu1 %v167_v3  ;;  %1524 = vmatpush3.msra.mxu0 %v35_v2  ;;  %v32_v13 = vld [vmem:[%s2172_s0 + $0x28] sm:$0xff]  ;;  %v33_v14 = vld [vmem:[%s2172_s0 + $0x30] sm:$0xff]  ;;  %v1849_v15 = vld [vmem:[%s2173_s5] sm:$0xff]  ;;  %v401_v2 = vlaneseq }
   0x6   :  { %1525 = vmatprep.mubr.msk.f32.mxu0 %vm37_vm0, %v27_v4  ;;  %1540 = vmatpush3.msra.mxu1 %v167_v3  ;;  %v34_v16 = vld [vmem:[%s2172_s0 + $0x38] sm:$0xff]  ;;  %v1445_v27 = vld [vmem:[%s2174_s4] ss:$0 sm:$0xff]  ;;  %s1722_s4 = smov 32  }
   0x7   :  { %1541 = vmatprep.mubr.msk.f32.mxu1 %vm37_vm0, %v27_v4  ;;  %1526 = vmatmul.mubr.msk.f32.vlgmr.msra.gmra.mxu0 %vm37_vm0, %v28_v5  ;;  %v1906_v1 = vld [vmem:[%s2175_s1] sm:$0xff] }
   0x8   :  { %1542 = vmatmul.mubr.msk.f32.vlgmr.msra.gmra.mxu1 %vm37_vm0, %v28_v5  ;;  %1553 = vmatprep.subr.mxu0 %v1720_v8  ;;  %v402_v5 = vshrl.u32 %v401_v2, 7  ;;  %v1728_v2 = vmov 5   ;;  %vm551_vm10 = vcmp.gt.s32.totalorder %v1906_v1, 1  ;;  %vm552_vm11 = vcmp.gt.s32.totalorder %v1906_v1, 6 }
   0x9   :  { %1528 = vmatprep.mubr.msk.f32.mxu0 %vm37_vm0, %v29_v6  ;;  %1554 = vmatpush3.msra.mxu0 %v1804_v7  ;;  %vm683_vm12 = vcmp.gt.s32.totalorder %v1906_v1, 2  ;;  %vm815_vm13 = vcmp.gt.s32.totalorder %v1906_v1, 3  ;;  %vm419_vm14 = vcmp.gt.s32.totalorder %v1906_v1, 0 }
   0xa   :  { %1544 = vmatprep.mubr.msk.f32.mxu1 %vm37_vm0, %v29_v6  ;;  %1555 = vmatprep.subr.mxu0 %v1720_v8  ;;  %v1914_v6 = vsub.s32 0, %v402_v5 }
   0xb   :  { %1564 = vmatprep.subr.mxu1 %v1720_v8  ;;  %1529 = vmatmul.mubr.msk.f32.gmra.mxu0 %vm37_vm0, %v30_v9 }
   0xc   :  { %1545 = vmatmul.mubr.msk.f32.gmra.mxu1 %vm37_vm0, %v30_v9  ;;  %1556 = vmatpush3.msra.mxu0 %v1818_v10  ;;  %v1726_v9 = vmov 7  }
   0xd   :  { %1531 = vmatprep.mubr.msk.f32.mxu0 %vm37_vm0, %v31_v11  ;;  %1547 = vmatprep.mubr.msk.f32.mxu1 %vm37_vm0, %v31_v11  ;;  %v400_v11 = vsel %vm37_vm0, 0, %v1726_v9 }
   0xe   :  { %1557 = vmatprep.subr.mxu0 %v1720_v8  ;;  %1565 = vmatpush3.msra.mxu1 %v1804_v7 }
   0xf   :  { %1558 = vmatpush3.msra.mxu0 %v1830_v12  ;;  %1566 = vmatprep.subr.mxu1 %v1720_v8 }
  0x10   :  { %1532 = vmatmul.mubr.msk.f32.gmra.mxu0 %vm37_vm0, %v32_v13  ;;  %1548 = vmatmul.mubr.msk.f32.gmra.mxu1 %vm37_vm0, %v32_v13  ;;  %v404_v13 = vrot.slane %v400_v11, %v1914_v6 }
  0x11   :  { %1534 = vmatprep.mubr.msk.f32.mxu0 %vm37_vm0, %v33_v14  ;;  %1550 = vmatprep.mubr.msk.f32.mxu1 %vm37_vm0, %v33_v14 }
  0x12   :  { %1559 = vmatprep.subr.mxu0 %v1720_v8  ;;  %1567 = vmatpush3.msra.mxu1 %v1818_v10 }
  0x13   :  { %1560 = vmatpush3.msra.mxu0 %v1849_v15  ;;  %1568 = vmatprep.subr.mxu1 %v1720_v8 }
  0x14   :  { %1535 = vmatmul.mubr.msk.f32.gmra.mxu0 %vm37_vm0, %v34_v16  ;;  %1551 = vmatmul.mubr.msk.f32.gmra.mxu1 %vm37_vm0, %v34_v16 }
  0x15   :  { %1561 = vmatprep.mubr.msk.f32.mxu0 %vm1721_vm1, %v1720_v8  ;;  %1569 = vmatpush3.msra.mxu1 %v1830_v12 }
  0x16   :  { %1572 = vmatprep.mubr.msk.f32.mxu1 %vm1721_vm1, %v1720_v8  ;;  %1570 = vmatprep.subr.mxu1 %v1720_v8 }
  0x17   :  { %1575 = vmatprep.subr.mxu0 %v1720_v8  ;;  %1571 = vmatpush3.msra.mxu1 %v1849_v15 }
  0x18   :  { %1562 = vmatmul.mubr.f32.vlgmr.msra.gmra.mxu0 %v1720_v8  ;;  %1586 = vmatprep.subr.mxu1 %v1720_v8 }
  0x19   :  { %1576 = vmatpush3.msra.mxu0 %v1804_v7  ;;  %1583 = vmatprep.mubr.msk.f32.mxu0 %vm1721_vm1, %v1720_v8 }
  0x1a   :  { %1577 = vmatprep.subr.mxu0 %v1720_v8 }
  0x1b   :  { %1578 = vmatpush3.msra.mxu0 %v1818_v10 }
  0x1c   :  { %1579 = vmatprep.subr.mxu0 %v1720_v8 }
  0x1d   :  { %1580 = vmatpush3.msra.mxu0 %v1830_v12 }
  0x1e   :  { %1581 = vmatprep.subr.mxu0 %v1720_v8 }
  0x1f   :  { %1582 = vmatpush3.msra.mxu0 %v1849_v15 }
  0x20   :  { %1597 = vmatprep.subr.mxu0 %v1720_v8 }
  0xc7   :  { %v1527_v17 = vpop.f32.mrf.mxu0 }
  0xc8   :  { %v1543_v18 = vpop.f32.mrf.mxu1 }
  0xc9   :  { %v128_v19 = vpop.f32.mrf.mxu0 }
  0xca   :  { %v235_v20 = vpop.f32.mrf.mxu1 }
  0xcb   :  { %v1530_v21 = vpop.f32.mrf.mxu0 }
  0xcc   :  { %v1546_v22 = vpop.f32.mrf.mxu1 }
  0xcd   :  { %v138_v23 = vpop.f32.mrf.mxu0 }
  0xce   :  { %v245_v24 = vpop.f32.mrf.mxu1 }
  0xd0   :  { %v1533_v25 = vpop.f32.mrf.mxu0  ;;  %v1549_v26 = vpop.f32.mrf.mxu1 }
  0xd1   :  { %v291_v28 = vadd.f32 %v1533_v25, %v245_v24  ;;  %v285_v29 = vadd.f32 %v1549_v26, %v138_v23 }
  0xd2   :  { %v148_v30 = vpop.f32.mrf.mxu0  ;;  %v255_v31 = vpop.f32.mrf.mxu1 }
  0xd3   :  { %v289_v32 = vadd.f32 %v1546_v22, %v148_v30  ;;  %v287_v33 = vadd.f32 %v1530_v21, %v255_v31  ;;  %v1886_v34 = vadd.f32 %v1445_v27, %v285_v29  ;;  %v1888_v35 = vadd.f32 %v1445_v27, %v291_v28 }
  0xd4   :  { %v1536_v36 = vpop.f32.mrf.mxu0  ;;  %v1552_v37 = vpop.f32.mrf.mxu1 }
  0xd5   :  { %v295_v38 = vadd.f32 %v1536_v36, %v235_v20  ;;  %v275_v39 = vadd.f32 %v1552_v37, %v128_v19  ;;  %v1890_v40 = vadd.f32 %v1445_v27, %v287_v33  ;;  %v1892_v41 = vadd.f32 %v1445_v27, %v289_v32 }
  0xd6   :  { %v158_v42 = vpop.f32.mrf.mxu0  ;;  %v265_v43 = vpop.f32.mrf.mxu1  ;;  %v1727_v37 = vmov 6  }
  0xd7   :  { %v293_v44 = vadd.f32 %v1543_v18, %v158_v42  ;;  %v283_v45 = vadd.f32 %v1527_v17, %v265_v43  ;;  %v282_v46 = vadd.f32 %v1445_v27, %v275_v39  ;;  %v1894_v47 = vadd.f32 %v1445_v27, %v295_v38 }
  0xd8   :  { %v371_v48 = vpop.f32.mrf.mxu0  ;;  %v535_v38 = vsel %vm37_vm0, 1, %v1727_v37 }
  0xd9   :  { %v375_v49 = vadd.f32 %v371_v48, %v282_v46  ;;  %v284_v50 = vadd.f32 %v1445_v27, %v283_v45  ;;  %v1896_v51 = vadd.f32 %v1445_v27, %v293_v44  ;;  %v539_v42 = vrot.slane %v535_v38, %v1914_v6 }
  0xda   :  { %v1563_v52 = vpop.f32.mrf.mxu0 }
  0xdb   :  { %1656 = vtanh.f32 %v375_v49  ;;  %v1446_v54 = vmul.f32 -1.442695, %v375_v49 }
  0xdd   :  { %1658 = vpow2.f32 %v1446_v54 }
  0xe8   :  { %v1657_v53 = vpop.eup %1656 }
  0xe9   :  { %385 = vrot.lane.b32.xlu0 %v1657_v53, %s1722_s4 }
  0xea   :  { %v1659_v55 = vpop.eup %1658 }
  0xeb   :  { %v379_v56 = vadd.f32 1.0, %v1659_v55 }
  0xed   :  { %1660 = vrcp.f32 %v379_v56 }
  0xfa   :  { %v1661_v57 = vpop.eup %1660 }
  0xfb   :  { %v383_v61 = vmul.f32 0.0, %v1661_v57 }
 0x15b   :  { %v386_v58 = vpop.permute.xlu0 %385 }
 0x15c   :  { %v388_v59 = vmul.f32 %v1661_v57, %v386_v58 }
 0x15e   :  { %390 = vrot.lane.b32.xlu0 %v388_v59, %s1722_s4 }
 0x1d0   :  { %v391_v62 = vpop.permute.xlu0 %390 }
 0x1d1   :  { %v393_v63 = vadd.f32 %v391_v62, %v383_v61 }
 0x1d3   :  { %1662 = vtanh.f32 %v393_v63 }
 0x1e0   :  { %v1663_v0 = vpop.eup %1662 }
 0x1e1   :  { %396 = vrot.lane.b32.xlu1 %v1663_v0, %s1722_s4 }
 0x1e5   :  { %406 = vperm.xlu1 %1654, %v1906_v1  }
 0x1e9   :  { %415 = vrot.lane.b32.xlu1 %v393_v63, %s1724_s15 }
 0x253   :  { %v397_v3 = vpop.permute.xlu1 %396 }
 0x254   :  { %v1910_v4 = vmul.f32 %v1661_v57, %v397_v3  ;;  %v667_v3 = vsel %vm37_vm0, 2, %v1728_v2 }
 0x255   :  { %v671_v9 = vrot.slane %v667_v3, %v1914_v6 }
 0x256   :  { %410 = vrot.lane.b32.xlu0 %v1910_v4, %s1725_s16 }
 0x260   :  { %v1918_v14 = vpop.permute.xlu1 %406 }
 0x261   :  { %vm408_vm2 = vcmp.lt.s32.totalorder %v404_v13, %v1918_v14  ;;  %vm540_vm4 = vcmp.lt.s32.totalorder %v539_v42, %v1918_v14  ;;  %vm672_vm5 = vcmp.lt.s32.totalorder %v671_v9, %v1918_v14 }
 0x264   :  { %v416_v16 = vpop.permute.xlu1 %415 }
 0x265   :  { %v418_v17 = vsel %vm408_vm2, %v416_v16, 0.0 }
 0x266   :  { %515 = vrot.lane.b32.xlu1 %v418_v17, %s1722_s4 }
 0x2c8   :  { %v411_v18 = vpop.permute.xlu0 %410 }
 0x2c9   :  { %v413_v19 = vsel %vm408_vm2, %v411_v18, 0.0  ;;  %vm420_vm2 = vcmp.gt.s32.totalorder %v1906_v1, 7 }
 0x2ca   :  { %1573 = vmatmul.mubr.msk.f32.vlgmr.msra.gmra.mxu1 %vm301_vm3, %v413_v19 }
 0x2cb   :  { %1587 = vmatpush3.msra.mxu1 %v1804_v7  ;;  %1594 = vmatprep.mubr.msk.f32.mxu1 %vm1721_vm1, %v1720_v8 }
 0x2cc   :  { %1588 = vmatprep.subr.mxu1 %v1720_v8 }
 0x2cd   :  { %1589 = vmatpush3.msra.mxu1 %v1818_v10 }
 0x2ce   :  { %1590 = vmatprep.subr.mxu1 %v1720_v8 }
 0x2cf   :  { %1591 = vmatpush3.msra.mxu1 %v1830_v12 }
 0x2d0   :  { %1592 = vmatprep.subr.mxu1 %v1720_v8 }
 0x2d1   :  { %1593 = vmatpush3.msra.mxu1 %v1849_v15 }
 0x2d2   :  { %1608 = vmatprep.subr.mxu1 %v1720_v8 }
 0x2d8   :  { %v516_v30 = vpop.permute.xlu1 %515 }
 0x38a   :  { %v502_v20 = vpop.f32.mrf.mxu1 }
 0x38b   :  { %v506_v21 = vadd.f32 %v502_v20, %v284_v50 }
 0x38c   :  { %v1574_v22 = vpop.f32.mrf.mxu1 }
 0x38d   :  { %1664 = vtanh.f32 %v506_v21  ;;  %v1448_v24 = vmul.f32 -1.442695, %v506_v21 }
 0x38f   :  { %1666 = vpow2.f32 %v1448_v24 }
 0x39a   :  { %v1665_v23 = vpop.eup %1664 }
 0x39b   :  { %520 = vrot.lane.b32.xlu0 %v1665_v23, %s1722_s4 }
 0x39c   :  { %v1667_v25 = vpop.eup %1666 }
 0x39d   :  { %v510_v26 = vadd.f32 1.0, %v1667_v25 }
 0x39f   :  { %1668 = vrcp.f32 %v510_v26 }
 0x3ac   :  { %v1669_v27 = vpop.eup %1668 }
 0x3ad   :  { %v518_v31 = vmul.f32 %v1669_v27, %v516_v30 }
 0x40d   :  { %v521_v28 = vpop.permute.xlu0 %520 }
 0x40e   :  { %v523_v29 = vmul.f32 %v1669_v27, %v521_v28 }
 0x410   :  { %525 = vrot.lane.b32.xlu0 %v523_v29, %s1722_s4 }
 0x482   :  { %v526_v32 = vpop.permute.xlu0 %525 }
 0x483   :  { %v528_v33 = vadd.f32 %v526_v32, %v518_v31 }
 0x485   :  { %1670 = vtanh.f32 %v528_v33 }
 0x492   :  { %v1671_v36 = vpop.eup %1670 }
 0x493   :  { %531 = vrot.lane.b32.xlu1 %v1671_v36, %s1722_s4 }
 0x497   :  { %547 = vrot.lane.b32.xlu1 %v528_v33, %s1724_s15  ;;  %v1729_v33 = vmov 4  }
 0x498   :  { %v799_v36 = vsel %vm37_vm0, 3, %v1729_v33 }
 0x499   :  { %v803_v38 = vrot.slane %v799_v36, %v1914_v6 }
 0x49b   :  { %vm804_vm6 = vcmp.lt.s32.totalorder %v803_v38, %v1918_v14 }
 0x505   :  { %v532_v39 = vpop.permute.xlu1 %531 }
 0x506   :  { %v1939_v43 = vmul.f32 %v1669_v27, %v532_v39 }
 0x508   :  { %542 = vrot.lane.b32.xlu0 %v1939_v43, %s1725_s16 }
 0x509   :  { %v548_v44 = vpop.permute.xlu1 %547 }
 0x50a   :  { %v550_v45 = vsel %vm540_vm4, %v548_v44, %v418_v17 }
 0x50b   :  { %647 = vrot.lane.b32.xlu1 %v550_v45, %s1722_s4 }
 0x57a   :  { %v543_v46 = vpop.permute.xlu0 %542 }
 0x57b   :  { %v545_v48 = vsel %vm540_vm4, %v543_v46, %v413_v19 }
 0x57c   :  { %1584 = vmatmul.mubr.msk.f32.vlgmr.msra.gmra.mxu0 %vm301_vm3, %v545_v48 }
 0x57d   :  { %1598 = vmatpush3.msra.mxu0 %v1804_v7  ;;  %1605 = vmatprep.mubr.msk.f32.mxu0 %vm1721_vm1, %v1720_v8  ;;  %v648_v61 = vpop.permute.xlu1 %647 }
 0x57e   :  { %1599 = vmatprep.subr.mxu0 %v1720_v8 }
 0x57f   :  { %1600 = vmatpush3.msra.mxu0 %v1818_v10 }
 0x580   :  { %1601 = vmatprep.subr.mxu0 %v1720_v8 }
 0x581   :  { %1602 = vmatpush3.msra.mxu0 %v1830_v12 }
 0x582   :  { %1603 = vmatprep.subr.mxu0 %v1720_v8 }
 0x583   :  { %1604 = vmatpush3.msra.mxu0 %v1849_v15 }
 0x584   :  { %1619 = vmatprep.subr.mxu0 %v1720_v8 }
 0x63c   :  { %v634_v49 = vpop.f32.mrf.mxu0 }
 0x63d   :  { %v638_v50 = vadd.f32 %v634_v49, %v1886_v34 }
 0x63e   :  { %v1585_v52 = vpop.f32.mrf.mxu0 }
 0x63f   :  { %1672 = vtanh.f32 %v638_v50  ;;  %v1450_v54 = vmul.f32 -1.442695, %v638_v50 }
 0x641   :  { %1674 = vpow2.f32 %v1450_v54 }
 0x64c   :  { %v1673_v53 = vpop.eup %1672 }
 0x64d   :  { %652 = vrot.lane.b32.xlu0 %v1673_v53, %s1722_s4 }
 0x64e   :  { %v1675_v55 = vpop.eup %1674 }
 0x64f   :  { %v642_v56 = vadd.f32 1.0, %v1675_v55 }
 0x651   :  { %1676 = vrcp.f32 %v642_v56 }
 0x65e   :  { %v1677_v57 = vpop.eup %1676 }
 0x65f   :  { %v650_v62 = vmul.f32 %v1677_v57, %v648_v61 }
 0x6bf   :  { %v653_v58 = vpop.permute.xlu0 %652 }
 0x6c0   :  { %v655_v59 = vmul.f32 %v1677_v57, %v653_v58 }
 0x6c2   :  { %657 = vrot.lane.b32.xlu0 %v655_v59, %s1722_s4 }
 0x734   :  { %v658_v63 = vpop.permute.xlu0 %657 }
 0x735   :  { %v660_v0 = vadd.f32 %v658_v63, %v650_v62 }
 0x737   :  { %1678 = vtanh.f32 %v660_v0 }
 0x744   :  { %v1679_v34 = vpop.eup %1678 }
 0x745   :  { %663 = vrot.lane.b32.xlu1 %v1679_v34, %s1722_s4 }
 0x749   :  { %679 = vrot.lane.b32.xlu1 %v660_v0, %s1724_s15  ;;  %v1730_v0 = vmov 3  }
 0x74a   :  { %v931_v34 = vsel %vm37_vm0, 4, %v1730_v0 }
 0x74b   :  { %v935_v3 = vrot.slane %v931_v34, %v1914_v6  ;;  %v553_v34 = vsel %vm551_vm10, 1, %v1723_v60 }
 0x74d   :  { %vm936_vm7 = vcmp.lt.s32.totalorder %v935_v3, %v1918_v14  ;;  %v685_v3 = vsel %vm683_vm12, 1, %v1723_v60  ;;  %vm1406_vm12 = vcmask 523264  }
 0x7b7   :  { %v664_v5 = vpop.permute.xlu1 %663 }
 0x7b8   :  { %v1963_v11 = vmul.f32 %v1677_v57, %v664_v5 }
 0x7ba   :  { %674 = vrot.lane.b32.xlu0 %v1963_v11, %s1725_s16 }
 0x7bb   :  { %v680_v13 = vpop.permute.xlu1 %679 }
 0x7bc   :  { %v682_v16 = vsel %vm672_vm5, %v680_v13, %v550_v45 }
 0x7bd   :  { %779 = vrot.lane.b32.xlu1 %v682_v16, %s1722_s4 }
 0x82c   :  { %v675_v17 = vpop.permute.xlu0 %674 }
 0x82d   :  { %v677_v18 = vsel %vm672_vm5, %v675_v17, %v545_v48  ;;  %vm816_vm5 = vcmp.gt.s32.totalorder %v1906_v1, 4 }
 0x82e   :  { %1595 = vmatmul.mubr.msk.f32.vlgmr.msra.gmra.mxu1 %vm301_vm3, %v677_v18 }
 0x82f   :  { %1609 = vmatpush3.msra.mxu1 %v1804_v7  ;;  %1616 = vmatprep.mubr.msk.f32.mxu1 %vm1721_vm1, %v1720_v8  ;;  %v780_v29 = vpop.permute.xlu1 %779 }
 0x830   :  { %1610 = vmatprep.subr.mxu1 %v1720_v8 }
 0x831   :  { %1611 = vmatpush3.msra.mxu1 %v1818_v10 }
 0x832   :  { %1612 = vmatprep.subr.mxu1 %v1720_v8 }
 0x833   :  { %1613 = vmatpush3.msra.mxu1 %v1830_v12 }
 0x834   :  { %1614 = vmatprep.subr.mxu1 %v1720_v8 }
 0x835   :  { %1615 = vmatpush3.msra.mxu1 %v1849_v15 }
 0x836   :  { %1630 = vmatprep.subr.mxu1 %v1720_v8 }
 0x8ee   :  { %v766_v19 = vpop.f32.mrf.mxu1 }
 0x8ef   :  { %v770_v20 = vadd.f32 %v766_v19, %v1890_v40 }
 0x8f0   :  { %v1596_v21 = vpop.f32.mrf.mxu1 }
 0x8f1   :  { %1680 = vtanh.f32 %v770_v20  ;;  %v1452_v23 = vmul.f32 -1.442695, %v770_v20 }
 0x8f3   :  { %1682 = vpow2.f32 %v1452_v23 }
 0x8fe   :  { %v1681_v22 = vpop.eup %1680 }
 0x8ff   :  { %784 = vrot.lane.b32.xlu0 %v1681_v22, %s1722_s4 }
 0x900   :  { %v1683_v24 = vpop.eup %1682 }
 0x901   :  { %v774_v25 = vadd.f32 1.0, %v1683_v24 }
 0x903   :  { %1684 = vrcp.f32 %v774_v25 }
 0x910   :  { %v1685_v26 = vpop.eup %1684 }
 0x911   :  { %v782_v30 = vmul.f32 %v1685_v26, %v780_v29 }
 0x971   :  { %v785_v27 = vpop.permute.xlu0 %784 }
 0x972   :  { %v787_v28 = vmul.f32 %v1685_v26, %v785_v27  ;;  %v1731_v27 = vmov 2  }
 0x974   :  { %789 = vrot.lane.b32.xlu0 %v787_v28, %s1722_s4  ;;  %v1051_v28 = vsel %vm37_vm0, 5, %v1731_v27 }
 0x9e6   :  { %v790_v31 = vpop.permute.xlu0 %789 }
 0x9e7   :  { %v792_v32 = vadd.f32 %v790_v31, %v782_v30  ;;  %v1055_v30 = vrot.slane %v1051_v28, %v1914_v6 }
 0x9e9   :  { %1686 = vtanh.f32 %v792_v32  ;;  %vm1056_vm8 = vcmp.lt.s32.totalorder %v1055_v30, %v1918_v14 }
 0x9f6   :  { %v1687_v40 = vpop.eup %1686 }
 0x9f7   :  { %795 = vrot.lane.b32.xlu1 %v1687_v40, %s1722_s4 }
 0x9fb   :  { %811 = vrot.lane.b32.xlu1 %v792_v32, %s1724_s15 }
 0xa69   :  { %v796_v37 = vpop.permute.xlu1 %795 }
 0xa6a   :  { %v1987_v39 = vmul.f32 %v1685_v26, %v796_v37 }
 0xa6c   :  { %806 = vrot.lane.b32.xlu0 %v1987_v39, %s1725_s16 }
 0xa6d   :  { %v812_v42 = vpop.permute.xlu1 %811 }
 0xa6e   :  { %v814_v44 = vsel %vm804_vm6, %v812_v42, %v682_v16 }
 0xa6f   :  { %911 = vrot.lane.b32.xlu1 %v814_v44, %s1722_s4 }
 0xade   :  { %v807_v45 = vpop.permute.xlu0 %806 }
 0xadf   :  { %v809_v46 = vsel %vm804_vm6, %v807_v45, %v677_v18 }
 0xae0   :  { %1606 = vmatmul.mubr.msk.f32.vlgmr.msra.gmra.mxu0 %vm301_vm3, %v809_v46 }
 0xae1   :  { %1620 = vmatpush3.msra.mxu0 %v1804_v7  ;;  %1627 = vmatprep.mubr.msk.f32.mxu0 %vm1721_vm1, %v1720_v8  ;;  %v912_v59 = vpop.permute.xlu1 %911 }
 0xae2   :  { %1621 = vmatprep.subr.mxu0 %v1720_v8 }
 0xae3   :  { %1622 = vmatpush3.msra.mxu0 %v1818_v10 }
 0xae4   :  { %1623 = vmatprep.subr.mxu0 %v1720_v8 }
 0xae5   :  { %1624 = vmatpush3.msra.mxu0 %v1830_v12 }
 0xae6   :  { %1625 = vmatprep.subr.mxu0 %v1720_v8 }
 0xae7   :  { %1626 = vmatpush3.msra.mxu0 %v1849_v15 }
 0xba0   :  { %v898_v48 = vpop.f32.mrf.mxu0 }
 0xba1   :  { %v902_v49 = vadd.f32 %v898_v48, %v1892_v41 }
 0xba2   :  { %v1607_v50 = vpop.f32.mrf.mxu0 }
 0xba3   :  { %1688 = vtanh.f32 %v902_v49  ;;  %v1454_v53 = vmul.f32 -1.442695, %v902_v49 }
 0xba5   :  { %1690 = vpow2.f32 %v1454_v53 }
 0xbb0   :  { %v1689_v52 = vpop.eup %1688 }
 0xbb1   :  { %916 = vrot.lane.b32.xlu0 %v1689_v52, %s1722_s4 }
 0xbb2   :  { %v1691_v54 = vpop.eup %1690 }
 0xbb3   :  { %v906_v55 = vadd.f32 1.0, %v1691_v54 }
 0xbb5   :  { %1692 = vrcp.f32 %v906_v55 }
 0xbc2   :  { %v1693_v56 = vpop.eup %1692 }
 0xbc3   :  { %v914_v61 = vmul.f32 %v1693_v56, %v912_v59 }
 0xc23   :  { %v917_v57 = vpop.permute.xlu0 %916 }
 0xc24   :  { %v919_v58 = vmul.f32 %v1693_v56, %v917_v57  ;;  %v1732_v57 = vmov 1  }
 0xc26   :  { %921 = vrot.lane.b32.xlu0 %v919_v58, %s1722_s4  ;;  %v1171_v58 = vsel %vm37_vm0, 6, %v1732_v57 }
 0xc98   :  { %v922_v62 = vpop.permute.xlu0 %921 }
 0xc99   :  { %v924_v63 = vadd.f32 %v922_v62, %v914_v61  ;;  %v1175_v61 = vrot.slane %v1171_v58, %v1914_v6 }
 0xc9b   :  { %1694 = vtanh.f32 %v924_v63  ;;  %vm2052_vm9 = vcmp.lt.s32.totalorder %v1175_v61, %v1918_v14 }
 0xca8   :  { %v1695_v41 = vpop.eup %1694 }
 0xca9   :  { %927 = vrot.lane.b32.xlu1 %v1695_v41, %s1722_s4 }
 0xcad   :  { %943 = vrot.lane.b32.xlu1 %v924_v63, %s1724_s15 }
 0xd1b   :  { %v928_v2 = vpop.permute.xlu1 %927 }
 0xd1c   :  { %v2010_v5 = vmul.f32 %v1693_v56, %v928_v2  ;;  %v559_v2 = vsel %vm552_vm11, 1, %v1723_v60 }
 0xd1e   :  { %938 = vrot.lane.b32.xlu0 %v2010_v5, %s1725_s16 }
 0xd1f   :  { %v944_v9 = vpop.permute.xlu1 %943 }
 0xd20   :  { %v946_v13 = vsel %vm936_vm7, %v944_v9, %v814_v44  ;;  %v817_v9 = vsel %vm815_vm13, 1, %v1723_v60 }
 0xd21   :  { %1031 = vrot.lane.b32.xlu1 %v946_v13, %s1722_s4 }
 0xd90   :  { %v939_v16 = vpop.permute.xlu0 %938 }
 0xd91   :  { %v941_v17 = vsel %vm936_vm7, %v939_v16, %v809_v46 }
 0xd92   :  { %1617 = vmatmul.mubr.msk.f32.vlgmr.msra.gmra.mxu1 %vm301_vm3, %v941_v17 }
 0xd93   :  { %1631 = vmatpush3.msra.mxu1 %v1804_v7  ;;  %1638 = vmatprep.mubr.msk.f32.mxu1 %vm1721_vm1, %v1720_v8  ;;  %vm684_vm1 = vcmp.gt.s32.totalorder %v1906_v1, 5 }
 0xd94   :  { %1632 = vmatprep.subr.mxu1 %v1720_v8 }
 0xd95   :  { %1633 = vmatpush3.msra.mxu1 %v1818_v10 }
 0xd96   :  { %1634 = vmatprep.subr.mxu1 %v1720_v8 }
 0xd97   :  { %1635 = vmatpush3.msra.mxu1 %v1830_v12 }
 0xd98   :  { %1636 = vmatprep.subr.mxu1 %v1720_v8  ;;  %v1032_v8 = vpop.permute.xlu1 %1031 }
 0xd99   :  { %1637 = vmatpush3.msra.mxu1 %v1849_v15 }
 0xe52   :  { %v1018_v18 = vpop.f32.mrf.mxu1 }
 0xe53   :  { %v1022_v19 = vadd.f32 %v1018_v18, %v1888_v35 }
 0xe54   :  { %v1618_v20 = vpop.f32.mrf.mxu1 }
 0xe55   :  { %1696 = vtanh.f32 %v1022_v19  ;;  %v1456_v21 = vmul.f32 -1.442695, %v1022_v19 }
 0xe57   :  { %1698 = vpow2.f32 %v1456_v21 }
 0xe62   :  { %v1697_v7 = vpop.eup %1696 }
 0xe63   :  { %1036 = vrot.lane.b32.xlu0 %v1697_v7, %s1722_s4 }
 0xe64   :  { %v1699_v22 = vpop.eup %1698 }
 0xe65   :  { %v1026_v10 = vadd.f32 1.0, %v1699_v22 }
 0xe67   :  { %1700 = vrcp.f32 %v1026_v10 }
 0xe74   :  { %v1701_v23 = vpop.eup %1700 }
 0xe75   :  { %v1034_v15 = vmul.f32 %v1701_v23, %v1032_v8 }
 0xed5   :  { %v1037_v24 = vpop.permute.xlu0 %1036 }
 0xed6   :  { %v1039_v12 = vmul.f32 %v1701_v23, %v1037_v24 }
 0xed8   :  { %1041 = vrot.lane.b32.xlu0 %v1039_v12, %s1722_s4 }
 0xf4a   :  { %v1042_v25 = vpop.permute.xlu0 %1041 }
 0xf4b   :  { %v1044_v26 = vadd.f32 %v1042_v25, %v1034_v15 }
 0xf4d   :  { %1702 = vtanh.f32 %v1044_v26 }
 0xf5a   :  { %v1703_v35 = vpop.eup %1702 }
 0xf5b   :  { %1047 = vrot.lane.b32.xlu1 %v1703_v35, %s1722_s4 }
 0xf5f   :  { %1063 = vrot.lane.b32.xlu1 %v1044_v26, %s1724_s15  ;;  %v691_v26 = vsel %vm684_vm1, 1, %v1723_v60 }
 0xfcd   :  { %v1048_v29 = vpop.permute.xlu1 %1047 }
 0xfce   :  { %v2033_v31 = vmul.f32 %v1701_v23, %v1048_v29 }
 0xfd0   :  { %1058 = vrot.lane.b32.xlu0 %v2033_v31, %s1725_s16 }
 0xfd1   :  { %v1064_v32 = vpop.permute.xlu1 %1063 }
 0xfd2   :  { %v1066_v40 = vsel %vm1056_vm8, %v1064_v32, %v946_v13  ;;  %v421_v13 = vsel %vm419_vm14, 1, %v1723_v60  ;;  %vm1408_vm14 = vcmask 785408  }
 0xfd3   :  { %1151 = vrot.lane.b32.xlu1 %v1066_v40, %s1722_s4 }
0x1042   :  { %v1059_v33 = vpop.permute.xlu0 %1058 }
0x1043   :  { %v1061_v36 = vsel %vm1056_vm8, %v1059_v33, %v941_v17 }
0x1044   :  { %1628 = vmatmul.mubr.msk.f32.vlgmr.msra.gmra.mxu0 %vm301_vm3, %v1061_v36 }
0x1045   :  { %v1152_v53 = vpop.permute.xlu1 %1151 }
0x1104   :  { %v1138_v37 = vpop.f32.mrf.mxu0 }
0x1105   :  { %v1142_v38 = vadd.f32 %v1138_v37, %v1896_v51 }
0x1106   :  { %v1629_v42 = vpop.f32.mrf.mxu0 }
0x1107   :  { %1704 = vtanh.f32 %v1142_v38  ;;  %v1458_v45 = vmul.f32 -1.442695, %v1142_v38 }
0x1109   :  { %1706 = vpow2.f32 %v1458_v45 }
0x1114   :  { %v1705_v44 = vpop.eup %1704 }
0x1115   :  { %1156 = vrot.lane.b32.xlu0 %v1705_v44, %s1722_s4 }
0x1116   :  { %v1707_v46 = vpop.eup %1706 }
0x1117   :  { %v1146_v48 = vadd.f32 1.0, %v1707_v46 }
0x1119   :  { %1708 = vrcp.f32 %v1146_v48 }
0x1126   :  { %v1709_v49 = vpop.eup %1708 }
0x1127   :  { %v1154_v54 = vmul.f32 %v1709_v49, %v1152_v53 }
0x1187   :  { %v1157_v50 = vpop.permute.xlu0 %1156 }
0x1188   :  { %v1159_v52 = vmul.f32 %v1709_v49, %v1157_v50 }
0x118a   :  { %1161 = vrot.lane.b32.xlu0 %v1159_v52, %s1722_s4 }
0x11fc   :  { %v1162_v55 = vpop.permute.xlu0 %1161 }
0x11fd   :  { %v1164_v56 = vadd.f32 %v1162_v55, %v1154_v54 }
0x11ff   :  { %1710 = vtanh.f32 %v1164_v56 }
0x120c   :  { %v1711_v51 = vpop.eup %1710 }
0x120d   :  { %1167 = vrot.lane.b32.xlu1 %v1711_v51, %s1722_s4 }
0x1211   :  { %1183 = vrot.lane.b32.xlu1 %v1164_v56, %s1724_s15 }
0x127f   :  { %v1168_v59 = vpop.permute.xlu1 %1167 }
0x1280   :  { %v2047_v62 = vmul.f32 %v1709_v49, %v1168_v59 }
0x1282   :  { %1178 = vrot.lane.b32.xlu0 %v2047_v62, %s1725_s16 }
0x1283   :  { %v1184_v63 = vpop.permute.xlu1 %1183 }
0x1284   :  { %v2059_v0 = vsel %vm2052_vm9, %v1184_v63, %v1066_v40 }
0x1285   :  { %1271 = vrot.lane.b32.xlu1 %v2059_v0, %s1722_s4 }
0x1289   :  { %555 = vperm.xlu1 %1654, %v553_v34  }
0x128d   :  { %561 = vperm.xlu1 %1654, %v559_v2  }
0x1291   :  { %687 = vperm.xlu1 %1654, %v685_v3  }
0x1295   :  { %819 = vperm.xlu1 %1654, %v817_v9  }
0x1299   :  { %423 = vperm.xlu1 %1654, %v421_v13  }
0x12f4   :  { %v1179_v16 = vpop.permute.xlu0 %1178 }
0x12f5   :  { %v2074_v17 = vsel %vm2052_vm9, %v1179_v16, %v1061_v36  ;;  %v823_v36 = vsel %vm816_vm5, 1, %v1723_v60 }
0x12f6   :  { %1639 = vmatmul.mubr.msk.f32.vlgmr.msra.gmra.mxu1 %vm301_vm3, %v2074_v17 }
0x12f7   :  { %v1272_v18 = vpop.permute.xlu1 %1271 }
0x1304   :  { %v556_v19 = vpop.permute.xlu1 %555 }
0x1305   :  { %vm557_vm15 = vcmp.eq.s32.totalorder %v556_v19, 1 }
0x1306   :  { %v558_v20 = vsel %vm557_vm15, %v1939_v43, 0.0  ;;  %v1188_v1 = vsel %vm557_vm15, %v2047_v62, 0.0 }
0x1307   :  { %1319 = vrot.lane.b32.xlu1 %v558_v20, %s1725_s16 }
0x1308   :  { %v562_v29 = vpop.permute.xlu1 %561 }
0x1309   :  { %vm563_vm7 = vcmp.eq.s32.totalorder %v562_v29, 1 }
0x130a   :  { %v1187_v42 = vsel %vm563_vm7, %v2047_v62, 0.0  ;;  %v564_v48 = vsel %vm563_vm7, %v1939_v43, 0.0 }
0x130c   :  { %v688_v30 = vpop.permute.xlu1 %687 }
0x130d   :  { %vm689_vm6 = vcmp.eq.s32.totalorder %v688_v30, 1 }
0x130e   :  { %v690_v37 = vsel %vm689_vm6, %v1963_v11, 0.0  ;;  %v1068_v46 = vsel %vm689_vm6, %v2033_v31, 0.0 }
0x1310   :  { %v820_v38 = vpop.permute.xlu1 %819 }
0x1311   :  { %vm821_vm8 = vcmp.eq.s32.totalorder %v820_v38, 1 }
0x1312   :  { %v822_v44 = vsel %vm821_vm8, %v1987_v39, 0.0  ;;  %v948_v50 = vsel %vm821_vm8, %v2010_v5, 0.0 }
0x1314   :  { %v424_v53 = vpop.permute.xlu1 %423 }
0x1315   :  { %vm425_vm10 = vcmp.eq.s32.totalorder %v424_v53, 1 }
0x1316   :  { %v426_v43 = vsel %vm425_vm10, %v1910_v4, 0.0 }
0x1379   :  { %v1320_v55 = vpop.permute.xlu1 %1319 }
0x13b6   :  { %v1258_v7 = vpop.f32.mrf.mxu1 }
0x13b7   :  { %v1262_v21 = vadd.f32 %v1258_v7, %v1894_v47  ;;  %v427_v47 = vsel %vm420_vm2, 1, %v1723_v60 }
0x13b8   :  { %v1640_v22 = vpop.f32.mrf.mxu1 }
0x13b9   :  { %1712 = vtanh.f32 %v1262_v21  ;;  %v1460_v23 = vmul.f32 -1.442695, %v1262_v21 }
0x13bb   :  { %1714 = vpow2.f32 %v1460_v23 }
0x13c6   :  { %v1713_v10 = vpop.eup %1712 }
0x13c7   :  { %1276 = vrot.lane.b32.xlu0 %v1713_v10, %s1722_s4 }
0x13c8   :  { %v1715_v24 = vpop.eup %1714 }
0x13c9   :  { %v1266_v12 = vadd.f32 1.0, %v1715_v24 }
0x13cb   :  { %1716 = vrcp.f32 %v1266_v12 }
0x13d8   :  { %v1717_v8 = vpop.eup %1716 }
0x13d9   :  { %v1274_v35 = vmul.f32 %v1717_v8, %v1272_v18 }
0x1439   :  { %v1277_v15 = vpop.permute.xlu0 %1276 }
0x143a   :  { %v1279_v25 = vmul.f32 %v1717_v8, %v1277_v15 }
0x143c   :  { %1281 = vrot.lane.b32.xlu0 %v1279_v25, %s1722_s4 }
0x1440   :  { %693 = vperm.xlu0 %1655, %v691_v26  }
0x1444   :  { %429 = vperm.xlu0 %1655, %v427_v47  }
0x14ae   :  { %v1282_v27 = vpop.permute.xlu0 %1281 }
0x14af   :  { %v2088_v28 = vadd.f32 %v1282_v27, %v1274_v35 }
0x14b1   :  { %1718 = vtanh.f32 %v2088_v28 }
0x14bb   :  { %v694_v32 = vpop.permute.xlu0 %693 }
0x14bc   :  { %vm695_vm4 = vcmp.eq.s32.totalorder %v694_v32, 1 }
0x14bd   :  { %v1067_v40 = vsel %vm695_vm4, %v2033_v31, 0.0  ;;  %v696_v45 = vsel %vm695_vm4, %v1963_v11, 0.0 }
0x14be   :  { %v1719_v33 = vpop.eup %1718  ;;  %1355 = vrot.lane.b32.xlu1 %v1067_v40, %s1725_s16 }
0x14bf   :  { %1287 = vrot.lane.b32.xlu0 %v1719_v33, %s1722_s4  ;;  %v430_v49 = vpop.permute.xlu0 %429 }
0x14c0   :  { %vm431_vm9 = vcmp.eq.s32.totalorder %v430_v49, 1 }
0x14c1   :  { %v432_v11 = vsel %vm431_vm9, %v1910_v4, 0.0 }
0x14c2   :  { %1328 = vrot.lane.b32.xlu1 %v690_v37, %s1725_s16 }
0x14c3   :  { %825 = vperm.xlu0 %1655, %v823_v36  }
0x14c6   :  { %1364 = vrot.lane.b32.xlu1 %v1187_v42, %s1725_s16 }
0x14c7   :  { %1323 = vrot.lane.b32.xlu0 %v1188_v1, %s1725_s16 }
0x14ca   :  { %1337 = vrot.lane.b32.xlu1 %v822_v44, %s1725_s16 }
0x14cb   :  { %1359 = vrot.lane.b32.xlu0 %v696_v45, %s1725_s16 }
0x14cf   :  { %1332 = vrot.lane.b32.xlu0 %v1068_v46, %s1725_s16 }
0x14d3   :  { %1368 = vrot.lane.b32.xlu0 %v564_v48, %s1725_s16 }
0x14d7   :  { %1341 = vrot.lane.b32.xlu0 %v948_v50, %s1725_s16 }
0x14db   :  { %1377 = vrot.lane.b32.xlu0 %v432_v11, %s1725_s16 }
0x1530   :  { %v1356_v51 = vpop.permute.xlu1 %1355 }
0x1531   :  { %v1288_v52 = vpop.permute.xlu0 %1287 }
0x1532   :  { %v1290_v54 = vmul.f32 %v1717_v8, %v1288_v52  ;;  %v1291_v8 = vsel %vm37_vm0, 7, %v1723_v60 }
0x1533   :  { %v1295_v25 = vrot.slane %v1291_v8, %v1914_v6 }
0x1534   :  { %v1307_v31 = vsel %vm431_vm9, %v1290_v54, 0.0  ;;  %v1329_v4 = vpop.permute.xlu1 %1328  ;;  %v1308_v16 = vsel %vm425_vm10, %v1290_v54, 0.0 }
0x1535   :  { %1373 = vrot.lane.b32.xlu1 %v1307_v31, %s1725_s16  ;;  %vm1296_vm13 = vcmp.lt.s32.totalorder %v1295_v25, %v1918_v14 }
0x1538   :  { %v1365_v34 = vpop.permute.xlu1 %1364 }
0x1539   :  { %1310 = vrot.lane.b32.xlu1 %v426_v43, %s1725_s16 }
0x153c   :  { %v1338_v3 = vpop.permute.xlu1 %1337 }
0x153e   :  { %v826_v56 = vpop.permute.xlu0 %825 }
0x153f   :  { %vm827_vm11 = vcmp.eq.s32.totalorder %v826_v56, 1 }
0x1540   :  { %v828_v57 = vsel %vm827_vm11, %v1987_v39, 0.0  ;;  %v947_v58 = vsel %vm827_vm11, %v2010_v5, 0.0 }
0x1541   :  { %1350 = vrot.lane.b32.xlu0 %v828_v57, %s1725_s16  ;;  %1346 = vrot.lane.b32.xlu1 %v947_v58, %s1725_s16 }
0x1542   :  { %v1324_v59 = vpop.permute.xlu0 %1323 }
0x1543   :  { %v1326_v61 = vsel %vm37_vm0, %v1320_v55, %v1324_v59 }
0x1545   :  { %1382 = vrot.lane.b32.xlu1 %v1326_v61, %s1722_s4 }
0x1546   :  { %v1360_v62 = vpop.permute.xlu0 %1359 }
0x1547   :  { %v1362_v63 = vsel %vm37_vm0, %v1356_v51, %v1360_v62 }
0x1548   :  { %1394 = vrot.lane.b32.xlu0 %v1362_v63, %s1722_s4 }
0x154a   :  { %v1333_v41 = vpop.permute.xlu0 %1332 }
0x154b   :  { %v1335_v39 = vsel %vm37_vm0, %v1329_v4, %v1333_v41 }
0x154c   :  { %1386 = vrot.lane.b32.xlu1 %v1335_v39, %s1725_s16 }
0x154e   :  { %v1369_v5 = vpop.permute.xlu0 %1368 }
0x154f   :  { %v1371_v2 = vsel %vm37_vm0, %v1365_v34, %v1369_v5 }
0x1550   :  { %1298 = vrot.lane.b32.xlu1 %v1290_v54, %s1725_s16  ;;  %1398 = vrot.lane.b32.xlu0 %v1371_v2, %s1725_s16 }
0x1552   :  { %v1342_v9 = vpop.permute.xlu0 %1341 }
0x1553   :  { %v1344_v13 = vsel %vm37_vm0, %v1338_v3, %v1342_v9 }
0x1554   :  { %1303 = vrot.lane.b32.xlu0 %v2088_v28, %s1724_s15  ;;  %1390 = vrot.lane.b32.xlu1 %v1344_v13, %s1724_s15 }
0x1556   :  { %v1378_v18 = vpop.permute.xlu0 %1377 }
0x1558   :  { %1314 = vrot.lane.b32.xlu0 %v1308_v16, %s1725_s16 }
0x15a7   :  { %v1374_v19 = vpop.permute.xlu1 %1373 }
0x15a8   :  { %v1380_v20 = vsel %vm37_vm0, %v1374_v19, %v1378_v18 }
0x15a9   :  { %1402 = vrot.lane.b32.xlu0 %v1380_v20, %s1724_s15 }
0x15ab   :  { %v1311_v7 = vpop.permute.xlu1 %1310 }
0x15b3   :  { %v1351_v21 = vpop.permute.xlu0 %1350  ;;  %v1347_v22 = vpop.permute.xlu1 %1346 }
0x15b4   :  { %v1353_v10 = vsel %vm37_vm0, %v1347_v22, %v1351_v21 }
0x15b7   :  { %v1383_v23 = vpop.permute.xlu1 %1382 }
0x15ba   :  { %v1395_v24 = vpop.permute.xlu0 %1394 }
0x15bb   :  { %v1410_v12 = vsel %vm301_vm3, %v1353_v10, %v1395_v24 }
0x15be   :  { %v1387_v15 = vpop.permute.xlu1 %1386 }
0x15c2   :  { %v1399_v26 = vpop.permute.xlu0 %1398  ;;  %v1299_v47 = vpop.permute.xlu1 %1298 }
0x15c3   :  { %v1411_v35 = vsel %vm1406_vm12, %v1410_v12, %v1399_v26  ;;  %v1301_v27 = vsel %vm1296_vm13, %v1299_v47, %v2074_v17 }
0x15c4   :  { %1415 = vst.msk [vmem:[%s2176_s7] sm:$0xff] %vm301_vm3, %v1301_v27 }
0x15c6   :  { %v1304_v28 = vpop.permute.xlu0 %1303  ;;  %v1391_v17 = vpop.permute.xlu1 %1390 }
0x15c7   :  { %v1306_v60 = vsel %vm1296_vm13, %v1304_v28, %v2059_v0 }
0x15c8   :  { %1416 = vst.msk [vmem:[%s2177_s8] sm:$0xff] %vm301_vm3, %v1306_v60 }
0x15ca   :  { %v1315_v6 = vpop.permute.xlu0 %1314 }
0x15cb   :  { %v1317_v14 = vsel %vm37_vm0, %v1311_v7, %v1315_v6 }
0x15cc   :  { %v1405_v29 = vsel %vm301_vm3, %v1317_v14, %v1383_v23 }
0x15cd   :  { %v1407_v30 = vsel %vm1406_vm12, %v1405_v29, %v1387_v15 }
0x15ce   :  { %v1409_v32 = vsel %vm1408_vm14, %v1407_v30, %v1391_v17 }
0x15cf   :  { %1413 = vst [vmem:[%s2178_s6] sm:$0xff] %v1409_v32 }
0x161b   :  { %v1403_v0 = vpop.permute.xlu0 %1402 }
0x161c   :  { %v1412_v40 = vsel %vm1408_vm14, %v1411_v35, %v1403_v0 }
0x161d   :  { %1414 = vst [vmem:[%s2178_s6 + $0x8] sm:$0xff] %v1412_v40 }

</bundles_post_ra>
